<compile_context>
chip_gen: v7x
topology: tpu7x:2x2x1
jax: 0.10.0
libtpu: 0.0.40
codegen_flags: <defaults>
</compile_context>

<pallas_src>
import math

import jax
import jax.numpy as jnp
from jax.experimental import pallas as pl
from jax.experimental.pallas import tpu as pltpu

LANE = 128  # TPU lane width; hidden/output feature dims are padded to this.


def _round_up(n, m):
    return ((n + m - 1) // m) * m


# ----------------------------------------------------------------------------- kernel
def mlp_kernel(x_ref, w1_ref, w_ref, b_ref, o_ref):
    """Fused 6-layer MLP forward for one (batch_tile, ...) tile, fully in VMEM.

    x_ref : (bt, num_in)  f32   input tile (unpadded K)
    w1_ref: (num_in, D)   bf16  layer-1 weight (K unpadded, N padded to D)
    w_ref : (5, D, D)     bf16  layers 2..6 stacked weights (zero-padded)
    b_ref : (6, 1, D)     f32   stacked biases (zero-padded)
    o_ref : (bt, D)       bf16  padded output tile
    """
    h = x_ref[...].astype(jnp.bfloat16)                      # (bt, num_in)

    # Layer 1 (real contraction width, padded output width).
    y = jnp.dot(h, w1_ref[...], preferred_element_type=jnp.float32)
    y = y + b_ref[0]
    h = jnp.maximum(y, 0.0).astype(jnp.bfloat16)

    # Layers 2..6, statically unrolled (static index into the stacked weight ref).
    for k in range(5):
        y = jnp.dot(h, w_ref[k], preferred_element_type=jnp.float32)
        y = y + b_ref[k + 1]
        if k < 4:                                            # ReLU after layers 2..5
            h = jnp.maximum(y, 0.0).astype(jnp.bfloat16)

    # TODO(synk): training-mode dropout (stochastic masking via pltpu.prng_*) not implemented.
    o_ref[...] = y.astype(o_ref.dtype)                       # final layer: no activation


# ------------------------------------------------------------------------ param prep
def prepare_params(params):
    """One-time (model-load) padding + bf16 cast of the weights/biases."""
    num_in = params["W_1"].shape[0]
    outs = [params[f"W_{k}"].shape[1] for k in range(1, 7)]  # h1..h5, num_out
    D = max(_round_up(d, LANE) for d in outs)

    # Layer 1: keep K = num_in (real width), pad N to D.
    w1 = jnp.pad(params["W_1"].astype(jnp.bfloat16), ((0, 0), (0, D - outs[0])))

    # Layers 2..6: pad both dims to D and stack.
    w_rest = []
    for k in range(2, 7):
        w = params[f"W_{k}"].astype(jnp.bfloat16)
        w_rest.append(jnp.pad(w, ((0, D - w.shape[0]), (0, D - w.shape[1]))))
    w_stack = jnp.stack(w_rest)                              # (5, D, D) bf16

    # Biases: pad to D and stack; stay f32.
    b_list = []
    for k in range(1, 7):
        b = params[f"b_{k}"].astype(jnp.float32).reshape(1, -1)
        b_list.append(jnp.pad(b, ((0, 0), (0, D - b.shape[1]))))
    b_stack = jnp.stack(b_list)                              # (6, 1, D) f32

    return {"w1": w1, "w_stack": w_stack, "b_stack": b_stack,
            "num_in": num_in, "num_out": outs[-1], "D": D}


# --------------------------------------------------------------------------- wrapper
def net1_forward(x, prepared, *, batch_tile=512):
    """x: (B, num_in) float32. prepared: output of prepare_params. Returns (B, num_out) bf16."""
    B, num_in = x.shape
    assert num_in == prepared["num_in"]
    D = prepared["D"]
    num_out = prepared["num_out"]

    n_tiles = pl.cdiv(B, batch_tile)
    Bp = n_tiles * batch_tile
    xp = x if Bp == B else jnp.pad(x, ((0, Bp - B), (0, 0)))

    out = pl.pallas_call(
        mlp_kernel,
        out_shape=jax.ShapeDtypeStruct((Bp, D), jnp.bfloat16),
        grid=(n_tiles,),
        in_specs=[
            pl.BlockSpec((batch_tile, num_in), lambda i: (i, 0)),       # x tile
            pl.BlockSpec(prepared["w1"].shape, lambda i: (0, 0)),       # W1 (grid-invariant)
            pl.BlockSpec(prepared["w_stack"].shape, lambda i: (0, 0, 0)),  # W2..W6 stacked
            pl.BlockSpec(prepared["b_stack"].shape, lambda i: (0, 0, 0)),  # biases stacked
        ],
        out_specs=pl.BlockSpec((batch_tile, D), lambda i: (i, 0)),
        compiler_params=pltpu.CompilerParams(
            dimension_semantics=("parallel",),          # megacore split of the batch grid
            vmem_limit_bytes=48 * 1024 * 1024,          # headroom for big tiles; < v7x 64 MiB
        ),
    )(xp, prepared["w1"], prepared["w_stack"], prepared["b_stack"])

    return out[:B, :num_out]


# ------------------------------------------------------------------------------ init
def kaiming_uniform(key, fan_out, fan_in, dtype=jnp.float32):
    # torch.nn.init.kaiming_uniform_ default (a=0, fan_in mode, gain=sqrt(2)):
    # bound = sqrt(6 / fan_in). PyTorch weight is (out, in); we store (in, out).
    bound = math.sqrt(6.0 / fan_in)
    w = jax.random.uniform(key, (fan_out, fan_in), dtype=dtype,
                           minval=-bound, maxval=bound)
    return w.T


def make_params(key, num_in, num_h1, num_h2, num_h3, num_h4, num_h5, num_out):
    dims = [(num_h1, num_in), (num_h2, num_h1), (num_h3, num_h2),
            (num_h4, num_h3), (num_h5, num_h4), (num_out, num_h5)]
    params = {}
    keys = jax.random.split(key, len(dims))
    for idx, ((fan_out, fan_in), k) in enumerate(zip(dims, keys), start=1):
        params[f"W_{idx}"] = kaiming_uniform(k, fan_out, fan_in)
        # Module uses init.constant_(b, 0) -> zeros is the faithful init.
        params[f"b_{idx}"] = jnp.zeros((fan_out,), jnp.float32)
    return params


# ------------------------------------------------------------------------- reference
def net1_reference(x, params):
    # Mirrors the kernel's numerics: bf16 MXU operands, f32 accumulate/elementwise,
    # bf16 intermediate activations, bf16 final output.
    h = x.astype(jnp.bfloat16)
    y = None
    for k in range(1, 7):
        w = params[f"W_{k}"].astype(jnp.bfloat16)
        y = jnp.dot(h, w, preferred_element_type=jnp.float32)
        y = y + params[f"b_{k}"].reshape(1, -1)
        if k < 6:
            h = jnp.maximum(y, 0.0).astype(jnp.bfloat16)
    return y.astype(jnp.bfloat16)


if __name__ == "__main__":
    key = jax.random.PRNGKey(0)
    kx, kp = jax.random.split(key)

    # Shapes consistent with Net1: narrow features (padded to one 128-lane slab) and
    # a batch that gives 4 even grid steps at batch_tile=512 (v7x: 2 steps per core,
    # so the input DMA can be double-buffered; v5e/v6e: few large steps).
    B, num_in = 2048, 32
    num_h1, num_h2, num_h3, num_h4, num_h5, num_out = 64, 64, 32, 32, 64, 16
    drop_prob = 0.5  # dropout is identity at inference

    x = jax.random.normal(kx, (B, num_in), dtype=jnp.float32)
    params = make_params(kp, num_in, num_h1, num_h2, num_h3, num_h4,
                         num_h5, num_out)

    prepared = prepare_params(params)          # one-time weight pad/cast (hoisted)
    out = jax.block_until_ready(net1_forward(x, prepared, batch_tile=512))
    ref = net1_reference(x, params)

    assert out.shape == (B, num_out), out.shape
    out_f32 = out.astype(jnp.float32)
    ref_f32 = ref.astype(jnp.float32)
    max_diff = float(jnp.max(jnp.abs(out_f32 - ref_f32)))
    assert jnp.allclose(out_f32, ref_f32, atol=2e-2, rtol=2e-2), max_diff

    print("KERNEL_OK")
</pallas_src>

<mosaic_0001>
module attributes {stable_mosaic.version = 11 : i64} {
  func.func @mlp_kernel(%arg0: i32, %arg1: memref<512x32xf32, #tpu.memory_space<vmem>>, %arg2: memref<32x128xbf16, #tpu.memory_space<vmem>>, %arg3: memref<5x128x128xbf16, #tpu.memory_space<vmem>>, %arg4: memref<6x1x128xf32, #tpu.memory_space<vmem>>, %arg5: memref<512x128xbf16, #tpu.memory_space<vmem>>) attributes {dimension_semantics = [#tpu.dimension_semantics<parallel>], iteration_bounds = array<i64: 4>, scalar_prefetch = 0 : i64, scratch_operands = 0 : i64, tpu.core_type = #tpu.core_type<tc>, window_params = [{transform_indices = @transform_0, window_bounds = array<i64: 512, 32>}, {pipeline_mode = #tpu.pipeline_mode<synchronous>, transform_indices = @transform_1, window_bounds = array<i64: 32, 128>}, {pipeline_mode = #tpu.pipeline_mode<synchronous>, transform_indices = @transform_2, window_bounds = array<i64: 5, 128, 128>}, {pipeline_mode = #tpu.pipeline_mode<synchronous>, transform_indices = @transform_3, window_bounds = array<i64: 6, 1, 128>}, {transform_indices = @transform_4, window_bounds = array<i64: 512, 128>}]} {
    %c0 = arith.constant 0 : index
    %c0_0 = arith.constant 0 : index
    %0 = vector.load %arg1[%c0, %c0_0] : memref<512x32xf32, #tpu.memory_space<vmem>>, vector<512x32xf32>
    %1 = arith.truncf %0 : vector<512x32xf32> to vector<512x32xbf16>
    %c0_1 = arith.constant 0 : index
    %c0_2 = arith.constant 0 : index
    %2 = vector.load %arg2[%c0_1, %c0_2] : memref<32x128xbf16, #tpu.memory_space<vmem>>, vector<32x128xbf16>
    %cst = arith.constant dense<0.000000e+00> : vector<512x128xf32>
    %3 = tpu.matmul %1, %2, %cst {dimension_numbers = #tpu.dot_dimension_numbers<[1], [0], [0], [1], [0, 0, 1, 1], [], []>} : vector<512x32xbf16>, vector<32x128xbf16>, vector<512x128xf32> -> vector<512x128xf32>
    %c0_3 = arith.constant 0 : index
    %c0_4 = arith.constant 0 : index
    %c0_5 = arith.constant 0 : index
    %4 = vector.load %arg4[%c0_3, %c0_4, %c0_5] : memref<6x1x128xf32, #tpu.memory_space<vmem>>, vector<1x1x128xf32>
    %5 = vector.shape_cast %4 : vector<1x1x128xf32> to vector<1x128xf32>
    %6 = vector.broadcast %5 : vector<1x128xf32> to vector<512x128xf32>
    %7 = arith.addf %3, %6 : vector<512x128xf32>
    %cst_6 = arith.constant 0.000000e+00 : f32
    %8 = vector.broadcast %cst_6 : f32 to vector<512x128xf32>
    %9 = arith.maximumf %7, %8 : vector<512x128xf32>
    %10 = arith.truncf %9 : vector<512x128xf32> to vector<512x128xbf16>
    %c0_7 = arith.constant 0 : index
    %c0_8 = arith.constant 0 : index
    %c0_9 = arith.constant 0 : index
    %11 = vector.load %arg3[%c0_7, %c0_8, %c0_9] : memref<5x128x128xbf16, #tpu.memory_space<vmem>>, vector<1x128x128xbf16>
    %12 = vector.shape_cast %11 : vector<1x128x128xbf16> to vector<128x128xbf16>
    %cst_10 = arith.constant dense<0.000000e+00> : vector<512x128xf32>
    %13 = tpu.matmul %10, %12, %cst_10 {dimension_numbers = #tpu.dot_dimension_numbers<[1], [0], [0], [1], [0, 0, 1, 1], [], []>} : vector<512x128xbf16>, vector<128x128xbf16>, vector<512x128xf32> -> vector<512x128xf32>
    %c1 = arith.constant 1 : index
    %c0_11 = arith.constant 0 : index
    %c0_12 = arith.constant 0 : index
    %14 = vector.load %arg4[%c1, %c0_11, %c0_12] : memref<6x1x128xf32, #tpu.memory_space<vmem>>, vector<1x1x128xf32>
    %15 = vector.shape_cast %14 : vector<1x1x128xf32> to vector<1x128xf32>
    %16 = vector.broadcast %15 : vector<1x128xf32> to vector<512x128xf32>
    %17 = arith.addf %13, %16 : vector<512x128xf32>
    %cst_13 = arith.constant 0.000000e+00 : f32
    %18 = vector.broadcast %cst_13 : f32 to vector<512x128xf32>
    %19 = arith.maximumf %17, %18 : vector<512x128xf32>
    %20 = arith.truncf %19 : vector<512x128xf32> to vector<512x128xbf16>
    %c1_14 = arith.constant 1 : index
    %c0_15 = arith.constant 0 : index
    %c0_16 = arith.constant 0 : index
    %21 = vector.load %arg3[%c1_14, %c0_15, %c0_16] : memref<5x128x128xbf16, #tpu.memory_space<vmem>>, vector<1x128x128xbf16>
    %22 = vector.shape_cast %21 : vector<1x128x128xbf16> to vector<128x128xbf16>
    %cst_17 = arith.constant dense<0.000000e+00> : vector<512x128xf32>
    %23 = tpu.matmul %20, %22, %cst_17 {dimension_numbers = #tpu.dot_dimension_numbers<[1], [0], [0], [1], [0, 0, 1, 1], [], []>} : vector<512x128xbf16>, vector<128x128xbf16>, vector<512x128xf32> -> vector<512x128xf32>
    %c2 = arith.constant 2 : index
    %c0_18 = arith.constant 0 : index
    %c0_19 = arith.constant 0 : index
    %24 = vector.load %arg4[%c2, %c0_18, %c0_19] : memref<6x1x128xf32, #tpu.memory_space<vmem>>, vector<1x1x128xf32>
    %25 = vector.shape_cast %24 : vector<1x1x128xf32> to vector<1x128xf32>
    %26 = vector.broadcast %25 : vector<1x128xf32> to vector<512x128xf32>
    %27 = arith.addf %23, %26 : vector<512x128xf32>
    %cst_20 = arith.constant 0.000000e+00 : f32
    %28 = vector.broadcast %cst_20 : f32 to vector<512x128xf32>
    %29 = arith.maximumf %27, %28 : vector<512x128xf32>
    %30 = arith.truncf %29 : vector<512x128xf32> to vector<512x128xbf16>
    %c2_21 = arith.constant 2 : index
    %c0_22 = arith.constant 0 : index
    %c0_23 = arith.constant 0 : index
    %31 = vector.load %arg3[%c2_21, %c0_22, %c0_23] : memref<5x128x128xbf16, #tpu.memory_space<vmem>>, vector<1x128x128xbf16>
    %32 = vector.shape_cast %31 : vector<1x128x128xbf16> to vector<128x128xbf16>
    %cst_24 = arith.constant dense<0.000000e+00> : vector<512x128xf32>
    %33 = tpu.matmul %30, %32, %cst_24 {dimension_numbers = #tpu.dot_dimension_numbers<[1], [0], [0], [1], [0, 0, 1, 1], [], []>} : vector<512x128xbf16>, vector<128x128xbf16>, vector<512x128xf32> -> vector<512x128xf32>
    %c3 = arith.constant 3 : index
    %c0_25 = arith.constant 0 : index
    %c0_26 = arith.constant 0 : index
    %34 = vector.load %arg4[%c3, %c0_25, %c0_26] : memref<6x1x128xf32, #tpu.memory_space<vmem>>, vector<1x1x128xf32>
    %35 = vector.shape_cast %34 : vector<1x1x128xf32> to vector<1x128xf32>
    %36 = vector.broadcast %35 : vector<1x128xf32> to vector<512x128xf32>
    %37 = arith.addf %33, %36 : vector<512x128xf32>
    %cst_27 = arith.constant 0.000000e+00 : f32
    %38 = vector.broadcast %cst_27 : f32 to vector<512x128xf32>
    %39 = arith.maximumf %37, %38 : vector<512x128xf32>
    %40 = arith.truncf %39 : vector<512x128xf32> to vector<512x128xbf16>
    %c3_28 = arith.constant 3 : index
    %c0_29 = arith.constant 0 : index
    %c0_30 = arith.constant 0 : index
    %41 = vector.load %arg3[%c3_28, %c0_29, %c0_30] : memref<5x128x128xbf16, #tpu.memory_space<vmem>>, vector<1x128x128xbf16>
    %42 = vector.shape_cast %41 : vector<1x128x128xbf16> to vector<128x128xbf16>
    %cst_31 = arith.constant dense<0.000000e+00> : vector<512x128xf32>
    %43 = tpu.matmul %40, %42, %cst_31 {dimension_numbers = #tpu.dot_dimension_numbers<[1], [0], [0], [1], [0, 0, 1, 1], [], []>} : vector<512x128xbf16>, vector<128x128xbf16>, vector<512x128xf32> -> vector<512x128xf32>
    %c4 = arith.constant 4 : index
    %c0_32 = arith.constant 0 : index
    %c0_33 = arith.constant 0 : index
    %44 = vector.load %arg4[%c4, %c0_32, %c0_33] : memref<6x1x128xf32, #tpu.memory_space<vmem>>, vector<1x1x128xf32>
    %45 = vector.shape_cast %44 : vector<1x1x128xf32> to vector<1x128xf32>
    %46 = vector.broadcast %45 : vector<1x128xf32> to vector<512x128xf32>
    %47 = arith.addf %43, %46 : vector<512x128xf32>
    %cst_34 = arith.constant 0.000000e+00 : f32
    %48 = vector.broadcast %cst_34 : f32 to vector<512x128xf32>
    %49 = arith.maximumf %47, %48 : vector<512x128xf32>
    %50 = arith.truncf %49 : vector<512x128xf32> to vector<512x128xbf16>
    %c4_35 = arith.constant 4 : index
    %c0_36 = arith.constant 0 : index
    %c0_37 = arith.constant 0 : index
    %51 = vector.load %arg3[%c4_35, %c0_36, %c0_37] : memref<5x128x128xbf16, #tpu.memory_space<vmem>>, vector<1x128x128xbf16>
    %52 = vector.shape_cast %51 : vector<1x128x128xbf16> to vector<128x128xbf16>
    %cst_38 = arith.constant dense<0.000000e+00> : vector<512x128xf32>
    %53 = tpu.matmul %50, %52, %cst_38 {dimension_numbers = #tpu.dot_dimension_numbers<[1], [0], [0], [1], [0, 0, 1, 1], [], []>} : vector<512x128xbf16>, vector<128x128xbf16>, vector<512x128xf32> -> vector<512x128xf32>
    %c5 = arith.constant 5 : index
    %c0_39 = arith.constant 0 : index
    %c0_40 = arith.constant 0 : index
    %54 = vector.load %arg4[%c5, %c0_39, %c0_40] : memref<6x1x128xf32, #tpu.memory_space<vmem>>, vector<1x1x128xf32>
    %55 = vector.shape_cast %54 : vector<1x1x128xf32> to vector<1x128xf32>
    %56 = vector.broadcast %55 : vector<1x128xf32> to vector<512x128xf32>
    %57 = arith.addf %53, %56 : vector<512x128xf32>
    %58 = arith.truncf %57 : vector<512x128xf32> to vector<512x128xbf16>
    %c0_41 = arith.constant 0 : index
    %c0_42 = arith.constant 0 : index
    %59 = vector.load %arg5[%c0_41, %c0_42] : memref<512x128xbf16, #tpu.memory_space<vmem>>, vector<512x128xbf16>
    tpu.vector_store %arg5[%c0_41, %c0_42], %58 {strides = array<i32>} : memref<512x128xbf16, #tpu.memory_space<vmem>>, vector<512x128xbf16>,
    return
  }
  func.func @transform_0(%arg0: i32) -> (i32, i32) {
    %c0_i32 = arith.constant 0 : i32
    %c0_i32_0 = arith.constant 0 : i32
    return %arg0, %c0_i32 : i32, i32
  }
  func.func @transform_1(%arg0: i32) -> (i32, i32) {
    %c0_i32 = arith.constant 0 : i32
    %c0_i32_0 = arith.constant 0 : i32
    %c0_i32_1 = arith.constant 0 : i32
    return %c0_i32, %c0_i32_0 : i32, i32
  }
  func.func @transform_2(%arg0: i32) -> (i32, i32, i32) {
    %c0_i32 = arith.constant 0 : i32
    %c0_i32_0 = arith.constant 0 : i32
    %c0_i32_1 = arith.constant 0 : i32
    %c0_i32_2 = arith.constant 0 : i32
    return %c0_i32, %c0_i32_0, %c0_i32_1 : i32, i32, i32
  }
  func.func @transform_3(%arg0: i32) -> (i32, i32, i32) {
    %c0_i32 = arith.constant 0 : i32
    %c0_i32_0 = arith.constant 0 : i32
    %c0_i32_1 = arith.constant 0 : i32
    %c0_i32_2 = arith.constant 0 : i32
    return %c0_i32, %c0_i32_0, %c0_i32_1 : i32, i32, i32
  }
  func.func @transform_4(%arg0: i32) -> (i32, i32) {
    %c0_i32 = arith.constant 0 : i32
    %c0_i32_0 = arith.constant 0 : i32
    return %arg0, %c0_i32 : i32, i32
  }
}

</mosaic_0001>

<bundles_post_ra>
// kernel: tpu_custom_call.1
= control target key start
LH: loop header
LB: loop body
LE: loop exit
PB: predicated region body
PF: predicated region fallthrough
CT: control target
= control target key end

     0   :  { %9 = vsyncpa [#allocation3], 0  ;;  %s5543_s0 = inlined_call_operand.vmem [shape: f32[2048,32], index: 0, kind: input, shape index: {}]   ;;  %s5544_s1 = inlined_call_operand.vmem [shape: bf16[32,128], index: 1, kind: input, shape index: {}]   ;;  %s5545_s2 = inlined_call_operand.vmem [shape: bf16[5,128,128], index: 2, kind: input, shape index: {}]   ;;  %s5546_s3 = inlined_call_operand.vmem [shape: f32[6,1,128], index: 3, kind: input, shape index: {}]   ;;  %s5547_s4 = inlined_call_operand.hbm [shape: bf16[2048,128], index: 4, kind: output, shape index: {}]  }
   0x1   :  { %11 = vsyncpa [#allocation3 + $0x1], 0  ;;  %s4764_s15 = smov 0   ;;  %s4766_s16 = smov 0  }
   0x2   :  { %s4768_s17 = smov 0   ;;  %s4770_s18 = smov 0  }
   0x3 LB: > { %s4785_s19 = sadd.s32 4294967295, %s4734_s18   ;;  %s3390_s20 = sadd.s32 4294967294, %s4734_s18   ;;  %s4734_s18 = sphi %s4770_s18, %s5553_s18   ;;  %s4730_s17 = sphi %s4768_s17, %s5552_s17   ;;  %s4726_s16 = sphi %s4766_s16, %s5551_s16   ;;  %s4722_s15 = sphi %s4764_s15, %s5550_s15  }
   0x4   : > { %s4789_s21 = sadd.s32 1, %s4734_s18   ;;  %s113_s22 = sadd.s32 1, %s4730_s17 }
   0x5   : > { %s110_s23 = ssub.s32 %s4734_s18, %s4789_s21  ;;  %p123_p0 = scmp.ne.s32.totalorder %s4730_s17, %s4726_s16 }
   0x6   : > { %p111_p1 = scmp.eq.s32.totalorder %s110_s23, 0  ;;  %p124_p2 = scmp.eq.s32.totalorder %s4785_s19, 3 }
   0x7   : > { %p129_p3 = scmp.ne.s32.totalorder %s4726_s16, %s4722_s15  ;;  %p130_p4 = scmp.eq.s32.totalorder %s3390_s20, 3 }
   0x8   : > { %s4800_s24 = scalar_select %p111_p1, %s4730_s17, %s113_s22  }
   0x9   : > { %p4802_p5 = por %p124_p2, %p123_p0  ;;  %p4806_p6 = por %p130_p4, %p129_p3 }
   0xa   : > { %p3393_p7 = scmp.ge.s32.totalorder %s4734_s18, 1  ;;  %p166_p8 = scmp.lt.s32.totalorder %s4734_s18, 5 }
   0xc   : > { %p167_p9 = pnand %p3393_p7, %p166_p8 }
   0xd   : > { %v4630_v0 = vld [vmem:[%s5544_s1] sm:$0xff] (!%p167_p9)   ;;  %s3395_s29 = sshll.u32 (!%p167_p9), %s4785_s19, 6  ;;  %v4631_v1 = vld [vmem:[%s5544_s1 + $0x8] sm:$0xff] (!%p167_p9)   ;;  %v4634_v4 = vld [vmem:[%s5545_s2 + $0x10] sm:$0xff] (!%p167_p9)   ;;  %vm319_vm0 = vcmask (!%p167_p9), 261120   ;;  %s4736_s9 = smov (!%p167_p9), [#allocation2]  }
   0xe   : > { %170 = sbr.rel (%p167_p9) target bundleno = 1492 (0x5d4), region = 36  ;;  %p193_p10 = scmp.lt.s32.totalorder (!%p167_p9), %s3395_s29, 255  ;;  %4105 = vmatprep.subr.bf16.mxu0 (!%p167_p9), %v4630_v0  ;;  %v4632_v2 = vld [vmem:[%s5545_s2] sm:$0xff] (!%p167_p9)   ;;  %v4633_v3 = vld [vmem:[%s5545_s2 + $0x8] sm:$0xff] (!%p167_p9)   ;;  %v4635_v14 = vld [vmem:[%s5545_s2 + $0x18] sm:$0xff] (!%p167_p9)  }
   0xf   : > { %4106 = vmatpush3.bf16.msra.mxu0 (!%p167_p9), %v4630_v0  ;;  %4173 = vmatprep.subr.bf16.mxu1 (!%p167_p9), %v4632_v2  ;;  %v4636_v31 = vld [vmem:[%s5545_s2 + $0x20] sm:$0xff] (!%p167_p9)   ;;  %v4637_v32 = vld [vmem:[%s5545_s2 + $0x28] sm:$0xff] (!%p167_p9)  }
  0x10   : > { %4107 = vmatprep.subr.bf16.mxu0 (!%p167_p9), %v4631_v1  ;;  %4174 = vmatpush3.bf16.msra.mxu1 (!%p167_p9), %v4632_v2 }
  0x11   : > { %4175 = vmatprep.subr.bf16.mxu1 (!%p167_p9), %v4633_v3 }
  0x13   : > { %4108 = vmatpush3.bf16.msra.mxu0 (!%p167_p9), %v4631_v1 }
  0x14   : > { %4176 = vmatpush3.bf16.msra.mxu1 (!%p167_p9), %v4633_v3 }
  0x15   : > { %s5555_s29 = smov (!%p193_p10, %s3395_s29), 255  ;;  %4177 = vmatprep.subr.bf16.mxu1 %v4634_v4 }
  0x16   : > { %s3396_s10 = sshll.u32 %s5555_s29, 3  ;;  %s3679_s29 = sshll.u32 %s4785_s19, 12 }
  0x17   : > { %s4828_s13 = scalar_lea.vmem %s5543_s0, %s3396_s10  ;;  %s5494_s7 = scalar_lea.hbm %s5547_s4, %s3679_s29 }
  0x18   : > { %v200_v5 = vld [vmem:[%s4828_s13] sm:$0xff]  ;;  %v201_v6 = vld [vmem:[%s4828_s13 + $0x8] sm:$0xff]  ;;  %v202_v7 = vld [vmem:[%s4828_s13 + $0x10] sm:$0xff]  ;;  %4178 = vmatpush3.bf16.msra.mxu1 %v4634_v4  ;;  %s4676_s10 = sshll.u32 %s4736_s9, 4  ;;  %s4677_s10 = int_to_ptr.vmem [resolvable:$false] %s4676_s10 }
  0x19   : > { %v264_v8 = vpack.c.bf16 %v201_v6, %v200_v5  ;;  %v203_v9 = vld [vmem:[%s4828_s13 + $0x18] sm:$0xff]  ;;  %v204_v10 = vld [vmem:[%s4828_s13 + $0x20] sm:$0xff]  ;;  %v205_v11 = vld [vmem:[%s4828_s13 + $0x28] sm:$0xff]  ;;  %4179 = vmatprep.subr.bf16.mxu1 %v4635_v14  ;;  %s4678_s11 = scalar_lea.vmem %s4677_s10, 8192 }
  0x1a   : > { %v265_v12 = vpack.c.bf16 %v203_v9, %v202_v7  ;;  %v266_v13 = vpack.c.bf16 %v205_v11, %v204_v10  ;;  %v206_v15 = vld [vmem:[%s4828_s13 + $0x30] sm:$0xff]  ;;  %v207_v16 = vld [vmem:[%s4828_s13 + $0x38] sm:$0xff]  ;;  %v208_v17 = vld [vmem:[%s4828_s13 + $0x40] sm:$0xff] }
  0x1b   : > { %4109 = vmatprep.mubr.msk.bf16.mxu0 %vm319_vm0, %v264_v8  ;;  %v209_v18 = vld [vmem:[%s4828_s13 + $0x48] sm:$0xff]  ;;  %v267_v19 = vpack.c.bf16 %v207_v16, %v206_v15  ;;  %v210_v21 = vld [vmem:[%s4828_s13 + $0x50] sm:$0xff]  ;;  %v211_v22 = vld [vmem:[%s4828_s13 + $0x58] sm:$0xff] }
  0x1c   : > { %4110 = vmatmul.mubr.msk.bf16.vlgmr.msra.gmra.mrb[0].mxu0 %vm319_vm0, %v265_v12  ;;  %v268_v20 = vpack.c.bf16 %v209_v18, %v208_v17  ;;  %4180 = vmatpush3.bf16.msra.mxu1 %v4635_v14  ;;  %v212_v23 = vld [vmem:[%s4828_s13 + $0x60] sm:$0xff]  ;;  %v213_v24 = vld [vmem:[%s4828_s13 + $0x68] sm:$0xff]  ;;  %v269_v25 = vpack.c.bf16 %v211_v22, %v210_v21  ;;  %v214_v27 = vld [vmem:[%s4828_s13 + $0x70] sm:$0xff] }
  0x1d   : > { %4113 = vmatprep.mubr.msk.bf16.mxu0 %vm319_vm0, %v266_v13  ;;  %v270_v26 = vpack.c.bf16 %v213_v24, %v212_v23  ;;  %v215_v28 = vld [vmem:[%s4828_s13 + $0x78] sm:$0xff]  ;;  %v216_v29 = vld [vmem:[%s4828_s13 + $0x80] sm:$0xff]  ;;  %v217_v30 = vld [vmem:[%s4828_s13 + $0x88] sm:$0xff]  ;;  %4181 = vmatprep.subr.bf16.mxu1 %v4636_v31 }
  0x1e   : > { %v271_v33 = vpack.c.bf16 %v215_v28, %v214_v27  ;;  %v272_v34 = vpack.c.bf16 %v217_v30, %v216_v29  ;;  %v218_v35 = vld [vmem:[%s4828_s13 + $0x90] sm:$0xff]  ;;  %v219_v36 = vld [vmem:[%s4828_s13 + $0x98] sm:$0xff]  ;;  %v220_v37 = vld [vmem:[%s4828_s13 + $0xa0] sm:$0xff] }
  0x1f   : > { %v221_v38 = vld [vmem:[%s4828_s13 + $0xa8] sm:$0xff]  ;;  %v273_v39 = vpack.c.bf16 %v219_v36, %v218_v35  ;;  %v222_v41 = vld [vmem:[%s4828_s13 + $0xb0] sm:$0xff]  ;;  %v223_v42 = vld [vmem:[%s4828_s13 + $0xb8] sm:$0xff] }
  0x20   : > { %4182 = vmatpush3.bf16.msra.mxu1 %v4636_v31  ;;  %v274_v40 = vpack.c.bf16 %v221_v38, %v220_v37  ;;  %v224_v43 = vld [vmem:[%s4828_s13 + $0xc0] sm:$0xff]  ;;  %v225_v44 = vld [vmem:[%s4828_s13 + $0xc8] sm:$0xff]  ;;  %v275_v45 = vpack.c.bf16 %v223_v42, %v222_v41  ;;  %v226_v47 = vld [vmem:[%s4828_s13 + $0xd0] sm:$0xff] }
  0x21   : > { %4183 = vmatprep.subr.bf16.mxu1 %v4637_v32  ;;  %v276_v46 = vpack.c.bf16 %v225_v44, %v224_v43  ;;  %v227_v48 = vld [vmem:[%s4828_s13 + $0xd8] sm:$0xff]  ;;  %v228_v49 = vld [vmem:[%s4828_s13 + $0xe0] sm:$0xff]  ;;  %v229_v50 = vld [vmem:[%s4828_s13 + $0xe8] sm:$0xff] }
  0x22   : > { %v277_v51 = vpack.c.bf16 %v227_v48, %v226_v47  ;;  %v278_v52 = vpack.c.bf16 %v229_v50, %v228_v49  ;;  %v230_v53 = vld [vmem:[%s4828_s13 + $0xf0] sm:$0xff]  ;;  %v231_v54 = vld [vmem:[%s4828_s13 + $0xf8] sm:$0xff]  ;;  %v232_v55 = vld [vmem:[%s4828_s13 + $0x100] sm:$0xff] }
  0x23   : > { %v233_v56 = vld [vmem:[%s4828_s13 + $0x108] sm:$0xff]  ;;  %v279_v57 = vpack.c.bf16 %v231_v54, %v230_v53  ;;  %v234_v59 = vld [vmem:[%s4828_s13 + $0x110] sm:$0xff]  ;;  %v235_v60 = vld [vmem:[%s4828_s13 + $0x118] sm:$0xff] }
  0x24   : > { %4114 = vmatmul.mubr.msk.bf16.gmra.mrb[4].mxu0 %vm319_vm0, %v267_v19  ;;  %4184 = vmatpush3.bf16.msra.mxu1 %v4637_v32  ;;  %v280_v58 = vpack.c.bf16 %v233_v56, %v232_v55  ;;  %v236_v61 = vld [vmem:[%s4828_s13 + $0x120] sm:$0xff]  ;;  %v237_v62 = vld [vmem:[%s4828_s13 + $0x128] sm:$0xff]  ;;  %v281_v63 = vpack.c.bf16 %v235_v60, %v234_v59  ;;  %v238_v1 = vld [vmem:[%s4828_s13 + $0x130] sm:$0xff] }
  0x25   : > { %4117 = vmatprep.mubr.msk.bf16.mxu0 %vm319_vm0, %v268_v20  ;;  %v282_v0 = vpack.c.bf16 %v237_v62, %v236_v61  ;;  %v239_v2 = vld [vmem:[%s4828_s13 + $0x138] sm:$0xff]  ;;  %v240_v3 = vld [vmem:[%s4828_s13 + $0x140] sm:$0xff]  ;;  %v241_v4 = vld [vmem:[%s4828_s13 + $0x148] sm:$0xff] }
  0x26   : > { %v283_v5 = vpack.c.bf16 %v239_v2, %v238_v1  ;;  %v284_v6 = vpack.c.bf16 %v241_v4, %v240_v3  ;;  %v242_v7 = vld [vmem:[%s4828_s13 + $0x150] sm:$0xff]  ;;  %v243_v8 = vld [vmem:[%s4828_s13 + $0x158] sm:$0xff]  ;;  %v244_v9 = vld [vmem:[%s4828_s13 + $0x160] sm:$0xff] }
  0x27   : > { %v245_v10 = vld [vmem:[%s4828_s13 + $0x168] sm:$0xff]  ;;  %v285_v11 = vpack.c.bf16 %v243_v8, %v242_v7  ;;  %v246_v13 = vld [vmem:[%s4828_s13 + $0x170] sm:$0xff]  ;;  %v247_v14 = vld [vmem:[%s4828_s13 + $0x178] sm:$0xff] }
  0x28   : > { %v286_v12 = vpack.c.bf16 %v245_v10, %v244_v9  ;;  %v248_v15 = vld [vmem:[%s4828_s13 + $0x180] sm:$0xff]  ;;  %v249_v16 = vld [vmem:[%s4828_s13 + $0x188] sm:$0xff]  ;;  %v287_v17 = vpack.c.bf16 %v247_v14, %v246_v13  ;;  %v4638_v18 = vld [vmem:[%s5545_s2 + $0x30] sm:$0xff]  }
  0x29   : > { %v288_v19 = vpack.c.bf16 %v249_v16, %v248_v15  ;;  %4185 = vmatprep.subr.bf16.mxu1 %v4638_v18  ;;  %v4639_v20 = vld [vmem:[%s5545_s2 + $0x38] sm:$0xff]   ;;  %v250_v21 = vld [vmem:[%s4828_s13 + $0x190] sm:$0xff]  ;;  %v252_v23 = vld [vmem:[%s4828_s13 + $0x1a0] sm:$0xff] }
  0x2a   : > { %4186 = vmatpush3.bf16.msra.mxu1 %v4638_v18  ;;  %v251_v22 = vld [vmem:[%s4828_s13 + $0x198] sm:$0xff]  ;;  %v253_v24 = vld [vmem:[%s4828_s13 + $0x1a8] sm:$0xff]  ;;  %v254_v27 = vld [vmem:[%s4828_s13 + $0x1b0] sm:$0xff] }
  0x2b   : > { %4187 = vmatprep.subr.bf16.mxu1 %v4639_v20  ;;  %v255_v28 = vld [vmem:[%s4828_s13 + $0x1b8] sm:$0xff]  ;;  %v256_v29 = vld [vmem:[%s4828_s13 + $0x1c0] sm:$0xff]  ;;  %v257_v30 = vld [vmem:[%s4828_s13 + $0x1c8] sm:$0xff] }
  0x2c   : > { %4118 = vmatmul.mubr.msk.bf16.gmra.mrb[8].mxu0 %vm319_vm0, %v269_v25  ;;  %v289_v25 = vpack.c.bf16 %v251_v22, %v250_v21  ;;  %v291_v31 = vpack.c.bf16 %v255_v28, %v254_v27  ;;  %v292_v32 = vpack.c.bf16 %v257_v30, %v256_v29  ;;  %v260_v35 = vld [vmem:[%s4828_s13 + $0x1e0] sm:$0xff]  ;;  %v261_v36 = vld [vmem:[%s4828_s13 + $0x1e8] sm:$0xff]  ;;  %v4643_v53 = vld [vmem:[%s5545_s2 + $0x58] sm:$0xff]  }
  0x2d   : > { %4121 = vmatprep.mubr.msk.bf16.mxu0 %vm319_vm0, %v270_v26  ;;  %v290_v26 = vpack.c.bf16 %v253_v24, %v252_v23  ;;  %v294_v38 = vpack.c.bf16 %v261_v36, %v260_v35  ;;  %v4640_v42 = vld [vmem:[%s5545_s2 + $0x40] sm:$0xff]   ;;  %v4641_v43 = vld [vmem:[%s5545_s2 + $0x48] sm:$0xff]   ;;  %v4647_v21 = vld [vmem:[%s5545_s2 + $0x78] sm:$0xff]  }
  0x2e   : > { %4188 = vmatpush3.bf16.msra.mxu1 %v4639_v20  ;;  %4253 = vmatprep.subr.bf16.mxu0 %v4640_v42  ;;  %v4953_v44 = vld [vmem:[%s5546_s3] ss:$0 sm:$0xff] }
  0x2f   : > { %4254 = vmatpush3.bf16.msra.mxu0 %v4640_v42  ;;  %v4644_v60 = vld [vmem:[%s5545_s2 + $0x60] sm:$0xff]  }
  0x30   : > { %4255 = vmatprep.subr.bf16.mxu0 %v4641_v43 }
  0x33   : > { %4256 = vmatpush3.bf16.msra.mxu0 %v4641_v43 }
  0x34   : > { %4122 = vmatmul.mubr.msk.bf16.gmra.mrb[12].mxu0 %vm319_vm0, %v271_v33  ;;  %v258_v33 = vld [vmem:[%s4828_s13 + $0x1d0] sm:$0xff] }
  0x35   : > { %4125 = vmatprep.mubr.msk.bf16.mxu0 %vm319_vm0, %v272_v34  ;;  %v259_v34 = vld [vmem:[%s4828_s13 + $0x1d8] sm:$0xff] }
  0x36   : > { %v293_v37 = vpack.c.bf16 %v259_v34, %v258_v33 }
  0x3c   : > { %4126 = vmatmul.mubr.msk.bf16.gmra.mrb[16].mxu0 %vm319_vm0, %v273_v39  ;;  %v262_v39 = vld [vmem:[%s4828_s13 + $0x1f0] sm:$0xff] }
  0x3d   : > { %4129 = vmatprep.mubr.msk.bf16.mxu0 %vm319_vm0, %v274_v40  ;;  %v263_v40 = vld [vmem:[%s4828_s13 + $0x1f8] sm:$0xff]  ;;  %s189_s13 = sand.u32 1, %s4726_s16  }
  0x3e   : > { %v295_v41 = vpack.c.bf16 %v263_v40, %v262_v39  ;;  %s3394_s27 = sshll.u32 %s189_s13, 8  ;;  %s5502_s19 = scalar_lea.sflag [#allocation3], %s189_s13 }
  0x3f   : > { %s5397_s28 = scalar_lea.vmem [#allocation2], %s3394_s27 }
  0x40   : > { %s3328_s30 = sshll.u32 %s5397_s28, 4  ;;  %s5496_s30 = int_to_ptr.vmem [resolvable:$true] %s3328_s30 }
  0x41   : > { %s4672_s8 = scalar_lea.vmem %s5496_s30, 4096  ;;  %p4679_p0 = scmp.lt.s32.totalorder %s5496_s30, %s4677_s10 }
  0x42   : > { %p4673_p11 = scmp.ne.s32.totalorder %s5496_s30, %s4672_s8  ;;  %p4680_p1 = scmp.lt.s32.totalorder %s4678_s11, %s4672_s8 }
  0x44   : > { %4130 = vmatmul.mubr.msk.bf16.gmra.mrb[20].mxu0 %vm319_vm0, %v275_v45  ;;  %p4674_p12 = pnand %p4673_p11, %p4802_p5  ;;  %p4681_p2 = por %p4680_p1, %p4679_p0 }
  0x45   : > { %4133 = vmatprep.mubr.msk.bf16.mxu0 %vm319_vm0, %v276_v46 }
  0x46   : > { %p4675_p13 = pneg %p4674_p12 }
  0x48   : > { %p4682_p3 = pnand %p4681_p2, %p4675_p13 }
  0x4c   : > { %4134 = vmatmul.mubr.msk.bf16.gmra.mrb[24].mxu0 %vm319_vm0, %v277_v51 }
  0x4d   : > { %4137 = vmatprep.mubr.msk.bf16.mxu0 %vm319_vm0, %v278_v52  ;;  %v4642_v52 = vld [vmem:[%s5545_s2 + $0x50] sm:$0xff]  }
  0x4e   : > { %4257 = vmatprep.subr.bf16.mxu0 %v4642_v52 }
  0x4f   : > { %4258 = vmatpush3.bf16.msra.mxu0 %v4642_v52 }
  0x50   : > { %4259 = vmatprep.subr.bf16.mxu0 %v4643_v53 }
  0x53   : > { %4260 = vmatpush3.bf16.msra.mxu0 %v4643_v53 }
  0x54   : > { %4138 = vmatmul.mubr.msk.bf16.gmra.mrb[28].mxu0 %vm319_vm0, %v279_v57  ;;  %4261 = vmatprep.subr.bf16.mxu0 %v4644_v60 }
  0x55   : > { %4141 = vmatprep.mubr.msk.bf16.mxu0 %vm319_vm0, %v280_v58 }
  0x57   : > { %4262 = vmatpush3.bf16.msra.mxu0 %v4644_v60 }
  0x5c   : > { %4142 = vmatmul.mubr.msk.bf16.gmra.mrb[32].mxu0 %vm319_vm0, %v281_v63 }
  0x5d   : > { %4145 = vmatprep.mubr.msk.bf16.mxu0 %vm319_vm0, %v282_v0 }
  0x64   : > { %4146 = vmatmul.mubr.msk.bf16.gmra.mrb[36].mxu0 %vm319_vm0, %v283_v5  ;;  %v4645_v5 = vld [vmem:[%s5545_s2 + $0x68] sm:$0xff]  }
  0x65   : > { %4149 = vmatprep.mubr.msk.bf16.mxu0 %vm319_vm0, %v284_v6  ;;  %4263 = vmatprep.subr.bf16.mxu0 %v4645_v5 }
  0x66   : > { %4264 = vmatpush3.bf16.msra.mxu0 %v4645_v5 }
  0x6c   : > { %4150 = vmatmul.mubr.msk.bf16.gmra.mrb[40].mxu0 %vm319_vm0, %v285_v11 }
  0x6d   : > { %4153 = vmatprep.mubr.msk.bf16.mxu0 %vm319_vm0, %v286_v12  ;;  %v4646_v12 = vld [vmem:[%s5545_s2 + $0x70] sm:$0xff]  }
  0x6e   : > { %4265 = vmatprep.subr.bf16.mxu0 %v4646_v12 }
  0x6f   : > { %4266 = vmatpush3.bf16.msra.mxu0 %v4646_v12 }
  0x70   : > { %4267 = vmatprep.subr.bf16.mxu0 %v4647_v21 }
  0x73   : > { %4268 = vmatpush3.bf16.msra.mxu0 %v4647_v21 }
  0x74   : > { %4154 = vmatmul.mubr.msk.bf16.gmra.mrb[44].mxu0 %vm319_vm0, %v287_v17 }
  0x75   : > { %4157 = vmatprep.mubr.msk.bf16.mxu0 %vm319_vm0, %v288_v19 }
  0x7c   : > { %4158 = vmatmul.mubr.msk.bf16.gmra.mrb[48].mxu0 %vm319_vm0, %v289_v25 }
  0x7d   : > { %4161 = vmatprep.mubr.msk.bf16.mxu0 %vm319_vm0, %v290_v26 }
  0x84   : > { %4162 = vmatmul.mubr.msk.bf16.gmra.mrb[52].mxu0 %vm319_vm0, %v291_v31 }
  0x85   : > { %4165 = vmatprep.mubr.msk.bf16.mxu0 %vm319_vm0, %v292_v32 }
  0x8c   : > { %4166 = vmatmul.mubr.msk.bf16.gmra.mrb[56].mxu0 %vm319_vm0, %v293_v37 }
  0x8d   : > { %4169 = vmatprep.mubr.msk.bf16.mxu0 %vm319_vm0, %v294_v38 }
  0x94   : > { %4170 = vmatmul.mubr.msk.bf16.gmra.mrb[60].mxu0 %vm319_vm0, %v295_v41 }
  0xef   : > { %v4111_v45 = vpop.f32.mrb[0].mxu0 }
  0xf0   : > { %v459_v46 = vadd.f32 %v4111_v45, %v4953_v44  ;;  %v450_v47 = vpop.f32.mrb[1].mxu0 }
  0xf1   : > { %v451_v48 = vadd.f32 %v4953_v44, %v450_v47  ;;  %v4112_v49 = vpop.f32.mrb[2].mxu0 }
  0xf2   : > { %v462_v50 = vadd.f32 %v4112_v49, %v4953_v44  ;;  %v453_v51 = vpop.f32.mrb[3].mxu0  ;;  %v707_v55 = vmax.f32 %v459_v46, 0.0 }
  0xf3   : > { %v454_v54 = vadd.f32 %v4953_v44, %v453_v51  ;;  %v705_v57 = vmax.f32 %v451_v48, 0.0 }
  0xf4   : > { %v708_v56 = vmax.f32 %v462_v50, 0.0 }
  0xf5   : > { %v706_v58 = vmax.f32 %v454_v54, 0.0 }
  0xf6   : > { %v770_v59 = vpack.c.bf16 %v708_v56, %v707_v55 }
  0xf7   : > { %v4115_v61 = vpop.f32.mrb[4].mxu0  ;;  %v769_v62 = vpack.c.bf16 %v706_v58, %v705_v57 }
  0xf8   : > { %v475_v63 = vadd.f32 %v4115_v61, %v4953_v44  ;;  %v466_v0 = vpop.f32.mrb[5].mxu0 }
  0xf9   : > { %v467_v1 = vadd.f32 %v4953_v44, %v466_v0  ;;  %v4116_v2 = vpop.f32.mrb[6].mxu0  ;;  %4189 = vmatprep.mubr.bf16.mxu1 %v769_v62 }
  0xfa   : > { %v478_v3 = vadd.f32 %v4116_v2, %v4953_v44  ;;  %v469_v4 = vpop.f32.mrb[7].mxu0  ;;  %4190 = vmatmul.mubr.bf16.vlgmr.msra.gmra.mrb[0].mxu1 %v770_v59  ;;  %v711_v7 = vmax.f32 %v475_v63, 0.0 }
  0xfb   : > { %v470_v6 = vadd.f32 %v4953_v44, %v469_v4  ;;  %v709_v9 = vmax.f32 %v467_v1, 0.0 }
  0xfc   : > { %v712_v8 = vmax.f32 %v478_v3, 0.0 }
  0xfd   : > { %v710_v10 = vmax.f32 %v470_v6, 0.0 }
  0xfe   : > { %v772_v11 = vpack.c.bf16 %v712_v8, %v711_v7 }
  0xff   : > { %v771_v13 = vpack.c.bf16 %v710_v10, %v709_v9  ;;  %v4119_v14 = vpop.f32.mrb[8].mxu0 }
 0x100   : > { %v491_v15 = vadd.f32 %v4119_v14, %v4953_v44  ;;  %v482_v16 = vpop.f32.mrb[9].mxu0 }
 0x101   : > { %v483_v17 = vadd.f32 %v4953_v44, %v482_v16  ;;  %v4120_v18 = vpop.f32.mrb[10].mxu0  ;;  %4193 = vmatprep.mubr.bf16.mxu1 %v771_v13 }
 0x102   : > { %v494_v19 = vadd.f32 %v4120_v18, %v4953_v44  ;;  %v485_v20 = vpop.f32.mrb[11].mxu0  ;;  %4194 = vmatmul.mubr.bf16.gmra.mrb[4].mxu1 %v772_v11  ;;  %v715_v23 = vmax.f32 %v491_v15, 0.0 }
 0x103   : > { %v486_v22 = vadd.f32 %v4953_v44, %v485_v20  ;;  %v713_v25 = vmax.f32 %v483_v17, 0.0 }
 0x104   : > { %v716_v24 = vmax.f32 %v494_v19, 0.0 }
 0x105   : > { %v714_v26 = vmax.f32 %v486_v22, 0.0 }
 0x106   : > { %v774_v27 = vpack.c.bf16 %v716_v24, %v715_v23 }
 0x107   : > { %v773_v28 = vpack.c.bf16 %v714_v26, %v713_v25  ;;  %v4123_v29 = vpop.f32.mrb[12].mxu0 }
 0x108   : > { %v507_v30 = vadd.f32 %v4123_v29, %v4953_v44  ;;  %v498_v31 = vpop.f32.mrb[13].mxu0 }
 0x109   : > { %v499_v32 = vadd.f32 %v4953_v44, %v498_v31  ;;  %v4124_v33 = vpop.f32.mrb[14].mxu0  ;;  %4197 = vmatprep.mubr.bf16.mxu1 %v773_v28 }
 0x10a   : > { %v510_v34 = vadd.f32 %v4124_v33, %v4953_v44  ;;  %v501_v35 = vpop.f32.mrb[15].mxu0  ;;  %4198 = vmatmul.mubr.bf16.gmra.mrb[8].mxu1 %v774_v27  ;;  %v719_v37 = vmax.f32 %v507_v30, 0.0 }
 0x10b   : > { %v502_v36 = vadd.f32 %v4953_v44, %v501_v35  ;;  %v717_v39 = vmax.f32 %v499_v32, 0.0 }
 0x10c   : > { %v720_v38 = vmax.f32 %v510_v34, 0.0 }
 0x10d   : > { %v718_v40 = vmax.f32 %v502_v36, 0.0 }
 0x10e   : > { %v776_v41 = vpack.c.bf16 %v720_v38, %v719_v37 }
 0x10f   : > { %v775_v42 = vpack.c.bf16 %v718_v40, %v717_v39  ;;  %v4127_v43 = vpop.f32.mrb[16].mxu0 }
 0x110   : > { %v523_v45 = vadd.f32 %v4127_v43, %v4953_v44  ;;  %v514_v46 = vpop.f32.mrb[17].mxu0 }
 0x111   : > { %v515_v47 = vadd.f32 %v4953_v44, %v514_v46  ;;  %v4128_v48 = vpop.f32.mrb[18].mxu0  ;;  %4201 = vmatprep.mubr.bf16.mxu1 %v775_v42 }
 0x112   : > { %v526_v49 = vadd.f32 %v4128_v48, %v4953_v44  ;;  %v517_v50 = vpop.f32.mrb[19].mxu0  ;;  %4202 = vmatmul.mubr.bf16.gmra.mrb[12].mxu1 %v776_v41  ;;  %v723_v52 = vmax.f32 %v523_v45, 0.0 }
 0x113   : > { %v518_v51 = vadd.f32 %v4953_v44, %v517_v50  ;;  %v721_v54 = vmax.f32 %v515_v47, 0.0 }
 0x114   : > { %v724_v53 = vmax.f32 %v526_v49, 0.0 }
 0x115   : > { %v722_v55 = vmax.f32 %v518_v51, 0.0 }
 0x116   : > { %v778_v56 = vpack.c.bf16 %v724_v53, %v723_v52 }
 0x117   : > { %v777_v57 = vpack.c.bf16 %v722_v55, %v721_v54  ;;  %v4131_v58 = vpop.f32.mrb[20].mxu0 }
 0x118   : > { %v539_v59 = vadd.f32 %v4131_v58, %v4953_v44  ;;  %v530_v60 = vpop.f32.mrb[21].mxu0 }
 0x119   : > { %v531_v61 = vadd.f32 %v4953_v44, %v530_v60  ;;  %v4132_v62 = vpop.f32.mrb[22].mxu0  ;;  %4205 = vmatprep.mubr.bf16.mxu1 %v777_v57 }
 0x11a   : > { %v542_v63 = vadd.f32 %v4132_v62, %v4953_v44  ;;  %v533_v0 = vpop.f32.mrb[23].mxu0  ;;  %4206 = vmatmul.mubr.bf16.gmra.mrb[16].mxu1 %v778_v56  ;;  %v727_v2 = vmax.f32 %v539_v59, 0.0 }
 0x11b   : > { %v534_v1 = vadd.f32 %v4953_v44, %v533_v0  ;;  %v725_v4 = vmax.f32 %v531_v61, 0.0 }
 0x11c   : > { %v728_v3 = vmax.f32 %v542_v63, 0.0 }
 0x11d   : > { %v726_v5 = vmax.f32 %v534_v1, 0.0 }
 0x11e   : > { %v780_v6 = vpack.c.bf16 %v728_v3, %v727_v2 }
 0x11f   : > { %v779_v7 = vpack.c.bf16 %v726_v5, %v725_v4  ;;  %v4135_v8 = vpop.f32.mrb[24].mxu0 }
 0x120   : > { %v555_v9 = vadd.f32 %v4135_v8, %v4953_v44  ;;  %v546_v10 = vpop.f32.mrb[25].mxu0 }
 0x121   : > { %v547_v11 = vadd.f32 %v4953_v44, %v546_v10  ;;  %v4136_v12 = vpop.f32.mrb[26].mxu0  ;;  %4209 = vmatprep.mubr.bf16.mxu1 %v779_v7 }
 0x122   : > { %v558_v13 = vadd.f32 %v4136_v12, %v4953_v44  ;;  %v549_v14 = vpop.f32.mrb[27].mxu0  ;;  %4210 = vmatmul.mubr.bf16.gmra.mrb[20].mxu1 %v780_v6  ;;  %v731_v16 = vmax.f32 %v555_v9, 0.0 }
 0x123   : > { %v550_v15 = vadd.f32 %v4953_v44, %v549_v14  ;;  %v729_v18 = vmax.f32 %v547_v11, 0.0 }
 0x124   : > { %v732_v17 = vmax.f32 %v558_v13, 0.0 }
 0x125   : > { %v730_v19 = vmax.f32 %v550_v15, 0.0 }
 0x126   : > { %v782_v20 = vpack.c.bf16 %v732_v17, %v731_v16 }
 0x127   : > { %v781_v21 = vpack.c.bf16 %v730_v19, %v729_v18  ;;  %v4139_v22 = vpop.f32.mrb[28].mxu0 }
 0x128   : > { %v571_v23 = vadd.f32 %v4139_v22, %v4953_v44  ;;  %v562_v24 = vpop.f32.mrb[29].mxu0 }
 0x129   : > { %v563_v25 = vadd.f32 %v4953_v44, %v562_v24  ;;  %v4140_v26 = vpop.f32.mrb[30].mxu0  ;;  %4213 = vmatprep.mubr.bf16.mxu1 %v781_v21 }
 0x12a   : > { %v574_v27 = vadd.f32 %v4140_v26, %v4953_v44  ;;  %v565_v28 = vpop.f32.mrb[31].mxu0  ;;  %4214 = vmatmul.mubr.bf16.gmra.mrb[24].mxu1 %v782_v20  ;;  %v735_v30 = vmax.f32 %v571_v23, 0.0 }
 0x12b   : > { %v566_v29 = vadd.f32 %v4953_v44, %v565_v28  ;;  %v733_v32 = vmax.f32 %v563_v25, 0.0 }
 0x12c   : > { %v736_v31 = vmax.f32 %v574_v27, 0.0 }
 0x12d   : > { %v734_v33 = vmax.f32 %v566_v29, 0.0 }
 0x12e   : > { %v784_v34 = vpack.c.bf16 %v736_v31, %v735_v30 }
 0x12f   : > { %v783_v35 = vpack.c.bf16 %v734_v33, %v733_v32  ;;  %v4143_v36 = vpop.f32.mrb[32].mxu0 }
 0x130   : > { %v587_v37 = vadd.f32 %v4143_v36, %v4953_v44  ;;  %v578_v38 = vpop.f32.mrb[33].mxu0 }
 0x131   : > { %v579_v39 = vadd.f32 %v4953_v44, %v578_v38  ;;  %v4144_v40 = vpop.f32.mrb[34].mxu0  ;;  %4217 = vmatprep.mubr.bf16.mxu1 %v783_v35 }
 0x132   : > { %v590_v41 = vadd.f32 %v4144_v40, %v4953_v44  ;;  %v581_v42 = vpop.f32.mrb[35].mxu0  ;;  %4218 = vmatmul.mubr.bf16.gmra.mrb[28].mxu1 %v784_v34  ;;  %v739_v45 = vmax.f32 %v587_v37, 0.0 }
 0x133   : > { %v582_v43 = vadd.f32 %v4953_v44, %v581_v42  ;;  %v737_v47 = vmax.f32 %v579_v39, 0.0 }
 0x134   : > { %v740_v46 = vmax.f32 %v590_v41, 0.0 }
 0x135   : > { %v738_v48 = vmax.f32 %v582_v43, 0.0 }
 0x136   : > { %v786_v49 = vpack.c.bf16 %v740_v46, %v739_v45 }
 0x137   : > { %v785_v50 = vpack.c.bf16 %v738_v48, %v737_v47  ;;  %v4147_v51 = vpop.f32.mrb[36].mxu0 }
 0x138   : > { %v603_v52 = vadd.f32 %v4147_v51, %v4953_v44  ;;  %v594_v53 = vpop.f32.mrb[37].mxu0 }
 0x139   : > { %v595_v54 = vadd.f32 %v4953_v44, %v594_v53  ;;  %v4148_v55 = vpop.f32.mrb[38].mxu0  ;;  %4221 = vmatprep.mubr.bf16.mxu1 %v785_v50 }
 0x13a   : > { %v606_v56 = vadd.f32 %v4148_v55, %v4953_v44  ;;  %v597_v57 = vpop.f32.mrb[39].mxu0  ;;  %4222 = vmatmul.mubr.bf16.gmra.mrb[32].mxu1 %v786_v49  ;;  %v743_v59 = vmax.f32 %v603_v52, 0.0 }
 0x13b   : > { %v598_v58 = vadd.f32 %v4953_v44, %v597_v57  ;;  %v741_v61 = vmax.f32 %v595_v54, 0.0 }
 0x13c   : > { %v744_v60 = vmax.f32 %v606_v56, 0.0 }
 0x13d   : > { %v742_v62 = vmax.f32 %v598_v58, 0.0 }
 0x13e   : > { %v788_v63 = vpack.c.bf16 %v744_v60, %v743_v59 }
 0x13f   : > { %v787_v0 = vpack.c.bf16 %v742_v62, %v741_v61  ;;  %v4151_v1 = vpop.f32.mrb[40].mxu0 }
 0x140   : > { %v619_v2 = vadd.f32 %v4151_v1, %v4953_v44  ;;  %v610_v3 = vpop.f32.mrb[41].mxu0 }
 0x141   : > { %v611_v4 = vadd.f32 %v4953_v44, %v610_v3  ;;  %v4152_v5 = vpop.f32.mrb[42].mxu0  ;;  %4225 = vmatprep.mubr.bf16.mxu1 %v787_v0 }
 0x142   : > { %v622_v6 = vadd.f32 %v4152_v5, %v4953_v44  ;;  %v613_v7 = vpop.f32.mrb[43].mxu0  ;;  %4226 = vmatmul.mubr.bf16.gmra.mrb[36].mxu1 %v788_v63  ;;  %v747_v9 = vmax.f32 %v619_v2, 0.0 }
 0x143   : > { %v614_v8 = vadd.f32 %v4953_v44, %v613_v7  ;;  %v745_v11 = vmax.f32 %v611_v4, 0.0 }
 0x144   : > { %v748_v10 = vmax.f32 %v622_v6, 0.0 }
 0x145   : > { %v746_v12 = vmax.f32 %v614_v8, 0.0 }
 0x146   : > { %v790_v13 = vpack.c.bf16 %v748_v10, %v747_v9 }
 0x147   : > { %v789_v14 = vpack.c.bf16 %v746_v12, %v745_v11  ;;  %v4155_v15 = vpop.f32.mrb[44].mxu0 }
 0x148   : > { %v635_v16 = vadd.f32 %v4155_v15, %v4953_v44  ;;  %v626_v17 = vpop.f32.mrb[45].mxu0 }
 0x149   : > { %v627_v18 = vadd.f32 %v4953_v44, %v626_v17  ;;  %v4156_v19 = vpop.f32.mrb[46].mxu0  ;;  %4229 = vmatprep.mubr.bf16.mxu1 %v789_v14 }
 0x14a   : > { %v638_v20 = vadd.f32 %v4156_v19, %v4953_v44  ;;  %v629_v21 = vpop.f32.mrb[47].mxu0  ;;  %4230 = vmatmul.mubr.bf16.gmra.mrb[40].mxu1 %v790_v13  ;;  %v751_v23 = vmax.f32 %v635_v16, 0.0 }
 0x14b   : > { %v630_v22 = vadd.f32 %v4953_v44, %v629_v21  ;;  %v749_v25 = vmax.f32 %v627_v18, 0.0 }
 0x14c   : > { %v752_v24 = vmax.f32 %v638_v20, 0.0 }
 0x14d   : > { %v750_v26 = vmax.f32 %v630_v22, 0.0  ;;  %v4648_v22 = vld [vmem:[%s5545_s2 + $0x80] sm:$0xff]  }
 0x14e   : > { %v792_v27 = vpack.c.bf16 %v752_v24, %v751_v23  ;;  %4333 = vmatprep.subr.bf16.mxu1 %v4648_v22  ;;  %v4649_v23 = vld [vmem:[%s5545_s2 + $0x88] sm:$0xff]  }
 0x14f   : > { %v791_v28 = vpack.c.bf16 %v750_v26, %v749_v25  ;;  %v4159_v29 = vpop.f32.mrb[48].mxu0  ;;  %4334 = vmatpush3.bf16.msra.mxu1 %v4648_v22 }
 0x150   : > { %v651_v30 = vadd.f32 %v4159_v29, %v4953_v44  ;;  %v642_v31 = vpop.f32.mrb[49].mxu0  ;;  %4335 = vmatprep.subr.bf16.mxu1 %v4649_v23 }
 0x151   : > { %v643_v32 = vadd.f32 %v4953_v44, %v642_v31  ;;  %v4160_v33 = vpop.f32.mrb[50].mxu0  ;;  %4233 = vmatprep.mubr.bf16.mxu1 %v791_v28  ;;  %v4650_v31 = vld [vmem:[%s5545_s2 + $0x90] sm:$0xff]  }
 0x152   : > { %v654_v34 = vadd.f32 %v4160_v33, %v4953_v44  ;;  %v645_v35 = vpop.f32.mrb[51].mxu0  ;;  %4234 = vmatmul.mubr.bf16.gmra.mrb[44].mxu1 %v792_v27  ;;  %v755_v37 = vmax.f32 %v651_v30, 0.0 }
 0x153   : > { %v646_v36 = vadd.f32 %v4953_v44, %v645_v35  ;;  %v753_v39 = vmax.f32 %v643_v32, 0.0  ;;  %4336 = vmatpush3.bf16.msra.mxu1 %v4649_v23  ;;  %v4651_v32 = vld [vmem:[%s5545_s2 + $0x98] sm:$0xff]  }
 0x154   : > { %v756_v38 = vmax.f32 %v654_v34, 0.0  ;;  %4337 = vmatprep.subr.bf16.mxu1 %v4650_v31 }
 0x155   : > { %v754_v40 = vmax.f32 %v646_v36, 0.0 }
 0x156   : > { %v794_v41 = vpack.c.bf16 %v756_v38, %v755_v37 }
 0x157   : > { %v793_v42 = vpack.c.bf16 %v754_v40, %v753_v39  ;;  %v4163_v43 = vpop.f32.mrb[52].mxu0  ;;  %4338 = vmatpush3.bf16.msra.mxu1 %v4650_v31  ;;  %v4652_v39 = vld [vmem:[%s5545_s2 + $0xa0] sm:$0xff]  }
 0x158   : > { %v667_v45 = vadd.f32 %v4163_v43, %v4953_v44  ;;  %v658_v46 = vpop.f32.mrb[53].mxu0  ;;  %4339 = vmatprep.subr.bf16.mxu1 %v4651_v32 }
 0x159   : > { %v659_v47 = vadd.f32 %v4953_v44, %v658_v46  ;;  %v4164_v48 = vpop.f32.mrb[54].mxu0  ;;  %4237 = vmatprep.mubr.bf16.mxu1 %v793_v42 }
 0x15a   : > { %v670_v49 = vadd.f32 %v4164_v48, %v4953_v44  ;;  %v661_v50 = vpop.f32.mrb[55].mxu0  ;;  %4238 = vmatmul.mubr.bf16.gmra.mrb[48].mxu1 %v794_v41  ;;  %v759_v52 = vmax.f32 %v667_v45, 0.0 }
 0x15b   : > { %v662_v51 = vadd.f32 %v4953_v44, %v661_v50  ;;  %v757_v54 = vmax.f32 %v659_v47, 0.0  ;;  %4340 = vmatpush3.bf16.msra.mxu1 %v4651_v32 }
 0x15c   : > { %v760_v53 = vmax.f32 %v670_v49, 0.0  ;;  %4341 = vmatprep.subr.bf16.mxu1 %v4652_v39  ;;  %v4653_v49 = vld [vmem:[%s5545_s2 + $0xa8] sm:$0xff]  }
 0x15d   : > { %v758_v55 = vmax.f32 %v662_v51, 0.0 }
 0x15e   : > { %v796_v56 = vpack.c.bf16 %v760_v53, %v759_v52 }
 0x15f   : > { %v795_v57 = vpack.c.bf16 %v758_v55, %v757_v54  ;;  %v4167_v58 = vpop.f32.mrb[56].mxu0  ;;  %4342 = vmatpush3.bf16.msra.mxu1 %v4652_v39 }
 0x160   : > { %v683_v59 = vadd.f32 %v4167_v58, %v4953_v44  ;;  %v674_v60 = vpop.f32.mrb[57].mxu0  ;;  %4343 = vmatprep.subr.bf16.mxu1 %v4653_v49 }
 0x161   : > { %v675_v61 = vadd.f32 %v4953_v44, %v674_v60  ;;  %v4168_v62 = vpop.f32.mrb[58].mxu0  ;;  %4241 = vmatprep.mubr.bf16.mxu1 %v795_v57 }
 0x162   : > { %v686_v63 = vadd.f32 %v4168_v62, %v4953_v44  ;;  %v677_v0 = vpop.f32.mrb[59].mxu0  ;;  %4242 = vmatmul.mubr.bf16.gmra.mrb[52].mxu1 %v796_v56  ;;  %v763_v2 = vmax.f32 %v683_v59, 0.0  ;;  %v4654_v56 = vld [vmem:[%s5545_s2 + $0xb0] sm:$0xff]  }
 0x163   : > { %v678_v1 = vadd.f32 %v4953_v44, %v677_v0  ;;  %v761_v4 = vmax.f32 %v675_v61, 0.0  ;;  %4344 = vmatpush3.bf16.msra.mxu1 %v4653_v49 }
 0x164   : > { %v764_v3 = vmax.f32 %v686_v63, 0.0  ;;  %4345 = vmatprep.subr.bf16.mxu1 %v4654_v56 }
 0x165   : > { %v762_v5 = vmax.f32 %v678_v1, 0.0  ;;  %v4655_v1 = vld [vmem:[%s5545_s2 + $0xb8] sm:$0xff]  }
 0x166   : > { %v798_v6 = vpack.c.bf16 %v764_v3, %v763_v2 }
 0x167   : > { %v797_v7 = vpack.c.bf16 %v762_v5, %v761_v4  ;;  %v4171_v8 = vpop.f32.mrb[60].mxu0  ;;  %4346 = vmatpush3.bf16.msra.mxu1 %v4654_v56 }
 0x168   : > { %v699_v9 = vadd.f32 %v4171_v8, %v4953_v44  ;;  %v690_v10 = vpop.f32.mrb[61].mxu0  ;;  %4347 = vmatprep.subr.bf16.mxu1 %v4655_v1 }
 0x169   : > { %v691_v11 = vadd.f32 %v4953_v44, %v690_v10  ;;  %v4172_v12 = vpop.f32.mrb[62].mxu0  ;;  %4245 = vmatprep.mubr.bf16.mxu1 %v797_v7 }
 0x16a   : > { %v702_v13 = vadd.f32 %v4172_v12, %v4953_v44  ;;  %v693_v14 = vpop.f32.mrb[63].mxu0  ;;  %4246 = vmatmul.mubr.bf16.gmra.mrb[56].mxu1 %v798_v6  ;;  %v767_v16 = vmax.f32 %v699_v9, 0.0 }
 0x16b   : > { %v694_v15 = vadd.f32 %v4953_v44, %v693_v14  ;;  %v765_v18 = vmax.f32 %v691_v11, 0.0  ;;  %v5046_v44 = vld [vmem:[%s5546_s3 + $0x1] ss:$0 sm:$0xff]  ;;  %4348 = vmatpush3.bf16.msra.mxu1 %v4655_v1 }
 0x16c   : > { %v768_v17 = vmax.f32 %v702_v13, 0.0 }
 0x16d   : > { %v766_v19 = vmax.f32 %v694_v15, 0.0 }
 0x16e   : > { %v800_v20 = vpack.c.bf16 %v768_v17, %v767_v16 }
 0x16f   : > { %v799_v21 = vpack.c.bf16 %v766_v19, %v765_v18 }
 0x171   : > { %4249 = vmatprep.mubr.bf16.mxu1 %v799_v21 }
 0x172   : > { %4250 = vmatmul.mubr.bf16.gmra.mrb[60].mxu1 %v800_v20 }
 0x1cd   : > { %v4191_v24 = vpop.f32.mrb[0].mxu1 }
 0x1ce   : > { %v916_v25 = vadd.f32 %v4191_v24, %v5046_v44  ;;  %v907_v26 = vpop.f32.mrb[1].mxu1 }
 0x1cf   : > { %v908_v27 = vadd.f32 %v5046_v44, %v907_v26  ;;  %v4192_v28 = vpop.f32.mrb[2].mxu1 }
 0x1d0   : > { %v919_v29 = vadd.f32 %v4192_v28, %v5046_v44  ;;  %v910_v30 = vpop.f32.mrb[3].mxu1  ;;  %v1164_v34 = vmax.f32 %v916_v25, 0.0 }
 0x1d1   : > { %v911_v33 = vadd.f32 %v5046_v44, %v910_v30  ;;  %v1162_v36 = vmax.f32 %v908_v27, 0.0 }
 0x1d2   : > { %v1165_v35 = vmax.f32 %v919_v29, 0.0 }
 0x1d3   : > { %v1163_v37 = vmax.f32 %v911_v33, 0.0 }
 0x1d4   : > { %v1227_v38 = vpack.c.bf16 %v1165_v35, %v1164_v34 }
 0x1d5   : > { %v1226_v40 = vpack.c.bf16 %v1163_v37, %v1162_v36  ;;  %v4195_v41 = vpop.f32.mrb[4].mxu1 }
 0x1d6   : > { %v932_v42 = vadd.f32 %v4195_v41, %v5046_v44  ;;  %v923_v43 = vpop.f32.mrb[5].mxu1 }
 0x1d7   : > { %v924_v45 = vadd.f32 %v5046_v44, %v923_v43  ;;  %v4196_v46 = vpop.f32.mrb[6].mxu1  ;;  %4269 = vmatprep.mubr.bf16.mxu0 %v1226_v40 }
 0x1d8   : > { %v935_v47 = vadd.f32 %v4196_v46, %v5046_v44  ;;  %v926_v48 = vpop.f32.mrb[7].mxu1  ;;  %4270 = vmatmul.mubr.bf16.vlgmr.msra.gmra.mrb[64].mxu0 %v1227_v38  ;;  %v1168_v51 = vmax.f32 %v932_v42, 0.0 }
 0x1d9   : > { %v927_v50 = vadd.f32 %v5046_v44, %v926_v48  ;;  %v1166_v53 = vmax.f32 %v924_v45, 0.0 }
 0x1da   : > { %v1169_v52 = vmax.f32 %v935_v47, 0.0 }
 0x1db   : > { %v1167_v54 = vmax.f32 %v927_v50, 0.0 }
 0x1dc   : > { %v1229_v55 = vpack.c.bf16 %v1169_v52, %v1168_v51 }
 0x1dd   : > { %v1228_v57 = vpack.c.bf16 %v1167_v54, %v1166_v53  ;;  %v4199_v58 = vpop.f32.mrb[8].mxu1 }
 0x1de   : > { %v948_v59 = vadd.f32 %v4199_v58, %v5046_v44  ;;  %v939_v60 = vpop.f32.mrb[9].mxu1 }
 0x1df   : > { %v940_v61 = vadd.f32 %v5046_v44, %v939_v60  ;;  %v4200_v62 = vpop.f32.mrb[10].mxu1  ;;  %4273 = vmatprep.mubr.bf16.mxu0 %v1228_v57 }
 0x1e0   : > { %v951_v63 = vadd.f32 %v4200_v62, %v5046_v44  ;;  %v942_v0 = vpop.f32.mrb[11].mxu1  ;;  %4274 = vmatmul.mubr.bf16.gmra.mrb[68].mxu0 %v1229_v55  ;;  %v1172_v3 = vmax.f32 %v948_v59, 0.0 }
 0x1e1   : > { %v943_v2 = vadd.f32 %v5046_v44, %v942_v0  ;;  %v1170_v5 = vmax.f32 %v940_v61, 0.0 }
 0x1e2   : > { %v1173_v4 = vmax.f32 %v951_v63, 0.0 }
 0x1e3   : > { %v1171_v6 = vmax.f32 %v943_v2, 0.0 }
 0x1e4   : > { %v1231_v7 = vpack.c.bf16 %v1173_v4, %v1172_v3 }
 0x1e5   : > { %v1230_v8 = vpack.c.bf16 %v1171_v6, %v1170_v5  ;;  %v4203_v9 = vpop.f32.mrb[12].mxu1 }
 0x1e6   : > { %v964_v10 = vadd.f32 %v4203_v9, %v5046_v44  ;;  %v955_v11 = vpop.f32.mrb[13].mxu1 }
 0x1e7   : > { %v956_v12 = vadd.f32 %v5046_v44, %v955_v11  ;;  %v4204_v13 = vpop.f32.mrb[14].mxu1  ;;  %4277 = vmatprep.mubr.bf16.mxu0 %v1230_v8 }
 0x1e8   : > { %v967_v14 = vadd.f32 %v4204_v13, %v5046_v44  ;;  %v958_v15 = vpop.f32.mrb[15].mxu1  ;;  %4278 = vmatmul.mubr.bf16.gmra.mrb[72].mxu0 %v1231_v7  ;;  %v1176_v17 = vmax.f32 %v964_v10, 0.0 }
 0x1e9   : > { %v959_v16 = vadd.f32 %v5046_v44, %v958_v15  ;;  %v1174_v19 = vmax.f32 %v956_v12, 0.0 }
 0x1ea   : > { %v1177_v18 = vmax.f32 %v967_v14, 0.0 }
 0x1eb   : > { %v1175_v20 = vmax.f32 %v959_v16, 0.0 }
 0x1ec   : > { %v1233_v21 = vpack.c.bf16 %v1177_v18, %v1176_v17 }
 0x1ed   : > { %v1232_v22 = vpack.c.bf16 %v1175_v20, %v1174_v19  ;;  %v4207_v23 = vpop.f32.mrb[16].mxu1 }
 0x1ee   : > { %v980_v24 = vadd.f32 %v4207_v23, %v5046_v44  ;;  %v971_v25 = vpop.f32.mrb[17].mxu1 }
 0x1ef   : > { %v972_v26 = vadd.f32 %v5046_v44, %v971_v25  ;;  %v4208_v27 = vpop.f32.mrb[18].mxu1  ;;  %4281 = vmatprep.mubr.bf16.mxu0 %v1232_v22 }
 0x1f0   : > { %v983_v28 = vadd.f32 %v4208_v27, %v5046_v44  ;;  %v974_v29 = vpop.f32.mrb[19].mxu1  ;;  %4282 = vmatmul.mubr.bf16.gmra.mrb[76].mxu0 %v1233_v21  ;;  %v1180_v31 = vmax.f32 %v980_v24, 0.0 }
 0x1f1   : > { %v975_v30 = vadd.f32 %v5046_v44, %v974_v29  ;;  %v1178_v33 = vmax.f32 %v972_v26, 0.0 }
 0x1f2   : > { %v1181_v32 = vmax.f32 %v983_v28, 0.0 }
 0x1f3   : > { %v1179_v34 = vmax.f32 %v975_v30, 0.0 }
 0x1f4   : > { %v1235_v35 = vpack.c.bf16 %v1181_v32, %v1180_v31 }
 0x1f5   : > { %v1234_v36 = vpack.c.bf16 %v1179_v34, %v1178_v33  ;;  %v4211_v37 = vpop.f32.mrb[20].mxu1 }
 0x1f6   : > { %v996_v38 = vadd.f32 %v4211_v37, %v5046_v44  ;;  %v987_v39 = vpop.f32.mrb[21].mxu1 }
 0x1f7   : > { %v988_v40 = vadd.f32 %v5046_v44, %v987_v39  ;;  %v4212_v41 = vpop.f32.mrb[22].mxu1  ;;  %4285 = vmatprep.mubr.bf16.mxu0 %v1234_v36 }
 0x1f8   : > { %v999_v42 = vadd.f32 %v4212_v41, %v5046_v44  ;;  %v990_v43 = vpop.f32.mrb[23].mxu1  ;;  %4286 = vmatmul.mubr.bf16.gmra.mrb[80].mxu0 %v1235_v35  ;;  %v1184_v46 = vmax.f32 %v996_v38, 0.0 }
 0x1f9   : > { %v991_v45 = vadd.f32 %v5046_v44, %v990_v43  ;;  %v1182_v48 = vmax.f32 %v988_v40, 0.0 }
 0x1fa   : > { %v1185_v47 = vmax.f32 %v999_v42, 0.0 }
 0x1fb   : > { %v1183_v49 = vmax.f32 %v991_v45, 0.0 }
 0x1fc   : > { %v1237_v50 = vpack.c.bf16 %v1185_v47, %v1184_v46 }
 0x1fd   : > { %v1236_v51 = vpack.c.bf16 %v1183_v49, %v1182_v48  ;;  %v4215_v52 = vpop.f32.mrb[24].mxu1 }
 0x1fe   : > { %v1012_v53 = vadd.f32 %v4215_v52, %v5046_v44  ;;  %v1003_v54 = vpop.f32.mrb[25].mxu1 }
 0x1ff   : > { %v1004_v55 = vadd.f32 %v5046_v44, %v1003_v54  ;;  %v4216_v56 = vpop.f32.mrb[26].mxu1  ;;  %4289 = vmatprep.mubr.bf16.mxu0 %v1236_v51 }
 0x200   : > { %v1015_v57 = vadd.f32 %v4216_v56, %v5046_v44  ;;  %v1006_v58 = vpop.f32.mrb[27].mxu1  ;;  %4290 = vmatmul.mubr.bf16.gmra.mrb[84].mxu0 %v1237_v50  ;;  %v1188_v60 = vmax.f32 %v1012_v53, 0.0 }
 0x201   : > { %v1007_v59 = vadd.f32 %v5046_v44, %v1006_v58  ;;  %v1186_v62 = vmax.f32 %v1004_v55, 0.0 }
 0x202   : > { %v1189_v61 = vmax.f32 %v1015_v57, 0.0 }
 0x203   : > { %v1187_v63 = vmax.f32 %v1007_v59, 0.0 }
 0x204   : > { %v1239_v0 = vpack.c.bf16 %v1189_v61, %v1188_v60 }
 0x205   : > { %v1238_v1 = vpack.c.bf16 %v1187_v63, %v1186_v62  ;;  %v4219_v2 = vpop.f32.mrb[28].mxu1 }
 0x206   : > { %v1028_v3 = vadd.f32 %v4219_v2, %v5046_v44  ;;  %v1019_v4 = vpop.f32.mrb[29].mxu1 }
 0x207   : > { %v1020_v5 = vadd.f32 %v5046_v44, %v1019_v4  ;;  %v4220_v6 = vpop.f32.mrb[30].mxu1  ;;  %4293 = vmatprep.mubr.bf16.mxu0 %v1238_v1 }
 0x208   : > { %v1031_v7 = vadd.f32 %v4220_v6, %v5046_v44  ;;  %v1022_v8 = vpop.f32.mrb[31].mxu1  ;;  %4294 = vmatmul.mubr.bf16.gmra.mrb[88].mxu0 %v1239_v0  ;;  %v1192_v10 = vmax.f32 %v1028_v3, 0.0 }
 0x209   : > { %v1023_v9 = vadd.f32 %v5046_v44, %v1022_v8  ;;  %v1190_v12 = vmax.f32 %v1020_v5, 0.0 }
 0x20a   : > { %v1193_v11 = vmax.f32 %v1031_v7, 0.0 }
 0x20b   : > { %v1191_v13 = vmax.f32 %v1023_v9, 0.0 }
 0x20c   : > { %v1241_v14 = vpack.c.bf16 %v1193_v11, %v1192_v10 }
 0x20d   : > { %v1240_v15 = vpack.c.bf16 %v1191_v13, %v1190_v12  ;;  %v4223_v16 = vpop.f32.mrb[32].mxu1 }
 0x20e   : > { %v1044_v17 = vadd.f32 %v4223_v16, %v5046_v44  ;;  %v1035_v18 = vpop.f32.mrb[33].mxu1 }
 0x20f   : > { %v1036_v19 = vadd.f32 %v5046_v44, %v1035_v18  ;;  %v4224_v20 = vpop.f32.mrb[34].mxu1  ;;  %4297 = vmatprep.mubr.bf16.mxu0 %v1240_v15 }
 0x210   : > { %v1047_v21 = vadd.f32 %v4224_v20, %v5046_v44  ;;  %v1038_v22 = vpop.f32.mrb[35].mxu1  ;;  %4298 = vmatmul.mubr.bf16.gmra.mrb[92].mxu0 %v1241_v14  ;;  %v1196_v24 = vmax.f32 %v1044_v17, 0.0 }
 0x211   : > { %v1039_v23 = vadd.f32 %v5046_v44, %v1038_v22  ;;  %v1194_v26 = vmax.f32 %v1036_v19, 0.0 }
 0x212   : > { %v1197_v25 = vmax.f32 %v1047_v21, 0.0 }
 0x213   : > { %v1195_v27 = vmax.f32 %v1039_v23, 0.0 }
 0x214   : > { %v1243_v28 = vpack.c.bf16 %v1197_v25, %v1196_v24 }
 0x215   : > { %v1242_v29 = vpack.c.bf16 %v1195_v27, %v1194_v26  ;;  %v4227_v30 = vpop.f32.mrb[36].mxu1 }
 0x216   : > { %v1060_v31 = vadd.f32 %v4227_v30, %v5046_v44  ;;  %v1051_v32 = vpop.f32.mrb[37].mxu1 }
 0x217   : > { %v1052_v33 = vadd.f32 %v5046_v44, %v1051_v32  ;;  %v4228_v34 = vpop.f32.mrb[38].mxu1  ;;  %4301 = vmatprep.mubr.bf16.mxu0 %v1242_v29 }
 0x218   : > { %v1063_v35 = vadd.f32 %v4228_v34, %v5046_v44  ;;  %v1054_v36 = vpop.f32.mrb[39].mxu1  ;;  %4302 = vmatmul.mubr.bf16.gmra.mrb[96].mxu0 %v1243_v28  ;;  %v1200_v38 = vmax.f32 %v1060_v31, 0.0 }
 0x219   : > { %v1055_v37 = vadd.f32 %v5046_v44, %v1054_v36  ;;  %v1198_v40 = vmax.f32 %v1052_v33, 0.0 }
 0x21a   : > { %v1201_v39 = vmax.f32 %v1063_v35, 0.0 }
 0x21b   : > { %v1199_v41 = vmax.f32 %v1055_v37, 0.0 }
 0x21c   : > { %v1245_v42 = vpack.c.bf16 %v1201_v39, %v1200_v38 }
 0x21d   : > { %v1244_v43 = vpack.c.bf16 %v1199_v41, %v1198_v40  ;;  %v4231_v45 = vpop.f32.mrb[40].mxu1 }
 0x21e   : > { %v1076_v46 = vadd.f32 %v4231_v45, %v5046_v44  ;;  %v1067_v47 = vpop.f32.mrb[41].mxu1 }
 0x21f   : > { %v1068_v48 = vadd.f32 %v5046_v44, %v1067_v47  ;;  %v4232_v49 = vpop.f32.mrb[42].mxu1  ;;  %4305 = vmatprep.mubr.bf16.mxu0 %v1244_v43 }
 0x220   : > { %v1079_v50 = vadd.f32 %v4232_v49, %v5046_v44  ;;  %v1070_v51 = vpop.f32.mrb[43].mxu1  ;;  %4306 = vmatmul.mubr.bf16.gmra.mrb[100].mxu0 %v1245_v42  ;;  %v1204_v53 = vmax.f32 %v1076_v46, 0.0 }
 0x221   : > { %v1071_v52 = vadd.f32 %v5046_v44, %v1070_v51  ;;  %v1202_v55 = vmax.f32 %v1068_v48, 0.0 }
 0x222   : > { %v1205_v54 = vmax.f32 %v1079_v50, 0.0 }
 0x223   : > { %v1203_v56 = vmax.f32 %v1071_v52, 0.0 }
 0x224   : > { %v1247_v57 = vpack.c.bf16 %v1205_v54, %v1204_v53 }
 0x225   : > { %v1246_v58 = vpack.c.bf16 %v1203_v56, %v1202_v55  ;;  %v4235_v59 = vpop.f32.mrb[44].mxu1 }
 0x226   : > { %v1092_v60 = vadd.f32 %v4235_v59, %v5046_v44  ;;  %v1083_v61 = vpop.f32.mrb[45].mxu1 }
 0x227   : > { %v1084_v62 = vadd.f32 %v5046_v44, %v1083_v61  ;;  %v4236_v63 = vpop.f32.mrb[46].mxu1  ;;  %4309 = vmatprep.mubr.bf16.mxu0 %v1246_v58 }
 0x228   : > { %v1095_v0 = vadd.f32 %v4236_v63, %v5046_v44  ;;  %v1086_v1 = vpop.f32.mrb[47].mxu1  ;;  %4310 = vmatmul.mubr.bf16.gmra.mrb[104].mxu0 %v1247_v57  ;;  %v1208_v3 = vmax.f32 %v1092_v60, 0.0 }
 0x229   : > { %v1087_v2 = vadd.f32 %v5046_v44, %v1086_v1  ;;  %v1206_v5 = vmax.f32 %v1084_v62, 0.0 }
 0x22a   : > { %v1209_v4 = vmax.f32 %v1095_v0, 0.0 }
 0x22b   : > { %v1207_v6 = vmax.f32 %v1087_v2, 0.0  ;;  %v4656_v2 = vld [vmem:[%s5545_s2 + $0xc0] sm:$0xff]  }
 0x22c   : > { %v1249_v7 = vpack.c.bf16 %v1209_v4, %v1208_v3  ;;  %4413 = vmatprep.subr.bf16.mxu0 %v4656_v2  ;;  %v4657_v3 = vld [vmem:[%s5545_s2 + $0xc8] sm:$0xff]  }
 0x22d   : > { %v1248_v8 = vpack.c.bf16 %v1207_v6, %v1206_v5  ;;  %v4239_v9 = vpop.f32.mrb[48].mxu1  ;;  %4414 = vmatpush3.bf16.msra.mxu0 %v4656_v2 }
 0x22e   : > { %v1108_v10 = vadd.f32 %v4239_v9, %v5046_v44  ;;  %v1099_v11 = vpop.f32.mrb[49].mxu1  ;;  %4415 = vmatprep.subr.bf16.mxu0 %v4657_v3 }
 0x22f   : > { %v1100_v12 = vadd.f32 %v5046_v44, %v1099_v11  ;;  %v4240_v13 = vpop.f32.mrb[50].mxu1  ;;  %4313 = vmatprep.mubr.bf16.mxu0 %v1248_v8  ;;  %v4658_v11 = vld [vmem:[%s5545_s2 + $0xd0] sm:$0xff]  }
 0x230   : > { %v1111_v14 = vadd.f32 %v4240_v13, %v5046_v44  ;;  %v1102_v15 = vpop.f32.mrb[51].mxu1  ;;  %4314 = vmatmul.mubr.bf16.gmra.mrb[108].mxu0 %v1249_v7  ;;  %v1212_v17 = vmax.f32 %v1108_v10, 0.0 }
 0x231   : > { %v1103_v16 = vadd.f32 %v5046_v44, %v1102_v15  ;;  %v1210_v19 = vmax.f32 %v1100_v12, 0.0  ;;  %4416 = vmatpush3.bf16.msra.mxu0 %v4657_v3  ;;  %v4659_v12 = vld [vmem:[%s5545_s2 + $0xd8] sm:$0xff]  }
 0x232   : > { %v1213_v18 = vmax.f32 %v1111_v14, 0.0  ;;  %4417 = vmatprep.subr.bf16.mxu0 %v4658_v11 }
 0x233   : > { %v1211_v20 = vmax.f32 %v1103_v16, 0.0 }
 0x234   : > { %v1251_v21 = vpack.c.bf16 %v1213_v18, %v1212_v17 }
 0x235   : > { %v1250_v22 = vpack.c.bf16 %v1211_v20, %v1210_v19  ;;  %v4243_v23 = vpop.f32.mrb[52].mxu1  ;;  %4418 = vmatpush3.bf16.msra.mxu0 %v4658_v11  ;;  %v4660_v19 = vld [vmem:[%s5545_s2 + $0xe0] sm:$0xff]  }
 0x236   : > { %v1124_v24 = vadd.f32 %v4243_v23, %v5046_v44  ;;  %v1115_v25 = vpop.f32.mrb[53].mxu1  ;;  %4419 = vmatprep.subr.bf16.mxu0 %v4659_v12 }
 0x237   : > { %v1116_v26 = vadd.f32 %v5046_v44, %v1115_v25  ;;  %v4244_v27 = vpop.f32.mrb[54].mxu1  ;;  %4317 = vmatprep.mubr.bf16.mxu0 %v1250_v22 }
 0x238   : > { %v1127_v28 = vadd.f32 %v4244_v27, %v5046_v44  ;;  %v1118_v29 = vpop.f32.mrb[55].mxu1  ;;  %4318 = vmatmul.mubr.bf16.gmra.mrb[112].mxu0 %v1251_v21  ;;  %v1216_v31 = vmax.f32 %v1124_v24, 0.0 }
 0x239   : > { %v1119_v30 = vadd.f32 %v5046_v44, %v1118_v29  ;;  %v1214_v33 = vmax.f32 %v1116_v26, 0.0  ;;  %4420 = vmatpush3.bf16.msra.mxu0 %v4659_v12 }
 0x23a   : > { %v1217_v32 = vmax.f32 %v1127_v28, 0.0  ;;  %4421 = vmatprep.subr.bf16.mxu0 %v4660_v19  ;;  %v4661_v28 = vld [vmem:[%s5545_s2 + $0xe8] sm:$0xff]  }
 0x23b   : > { %v1215_v34 = vmax.f32 %v1119_v30, 0.0 }
 0x23c   : > { %v1253_v35 = vpack.c.bf16 %v1217_v32, %v1216_v31 }
 0x23d   : > { %v1252_v36 = vpack.c.bf16 %v1215_v34, %v1214_v33  ;;  %v4247_v37 = vpop.f32.mrb[56].mxu1  ;;  %4422 = vmatpush3.bf16.msra.mxu0 %v4660_v19 }
 0x23e   : > { %v1140_v38 = vadd.f32 %v4247_v37, %v5046_v44  ;;  %v1131_v39 = vpop.f32.mrb[57].mxu1  ;;  %4423 = vmatprep.subr.bf16.mxu0 %v4661_v28 }
 0x23f   : > { %v1132_v40 = vadd.f32 %v5046_v44, %v1131_v39  ;;  %v4248_v41 = vpop.f32.mrb[58].mxu1  ;;  %4321 = vmatprep.mubr.bf16.mxu0 %v1252_v36 }
 0x240   : > { %v1143_v42 = vadd.f32 %v4248_v41, %v5046_v44  ;;  %v1134_v43 = vpop.f32.mrb[59].mxu1  ;;  %4322 = vmatmul.mubr.bf16.gmra.mrb[116].mxu0 %v1253_v35  ;;  %v1220_v46 = vmax.f32 %v1140_v38, 0.0  ;;  %v4662_v35 = vld [vmem:[%s5545_s2 + $0xf0] sm:$0xff]  }
 0x241   : > { %v1135_v45 = vadd.f32 %v5046_v44, %v1134_v43  ;;  %v1218_v48 = vmax.f32 %v1132_v40, 0.0  ;;  %4424 = vmatpush3.bf16.msra.mxu0 %v4661_v28 }
 0x242   : > { %v1221_v47 = vmax.f32 %v1143_v42, 0.0  ;;  %4425 = vmatprep.subr.bf16.mxu0 %v4662_v35 }
 0x243   : > { %v1219_v49 = vmax.f32 %v1135_v45, 0.0  ;;  %v4663_v45 = vld [vmem:[%s5545_s2 + $0xf8] sm:$0xff]  }
 0x244   : > { %v1255_v50 = vpack.c.bf16 %v1221_v47, %v1220_v46 }
 0x245   : > { %v1254_v51 = vpack.c.bf16 %v1219_v49, %v1218_v48  ;;  %v4251_v52 = vpop.f32.mrb[60].mxu1  ;;  %4426 = vmatpush3.bf16.msra.mxu0 %v4662_v35 }
 0x246   : > { %v1156_v53 = vadd.f32 %v4251_v52, %v5046_v44  ;;  %v1147_v54 = vpop.f32.mrb[61].mxu1  ;;  %4427 = vmatprep.subr.bf16.mxu0 %v4663_v45 }
 0x247   : > { %v1148_v55 = vadd.f32 %v5046_v44, %v1147_v54  ;;  %v4252_v56 = vpop.f32.mrb[62].mxu1  ;;  %4325 = vmatprep.mubr.bf16.mxu0 %v1254_v51 }
 0x248   : > { %v1159_v57 = vadd.f32 %v4252_v56, %v5046_v44  ;;  %v1150_v58 = vpop.f32.mrb[63].mxu1  ;;  %4326 = vmatmul.mubr.bf16.gmra.mrb[120].mxu0 %v1255_v50  ;;  %v1224_v60 = vmax.f32 %v1156_v53, 0.0 }
 0x249   : > { %v1151_v59 = vadd.f32 %v5046_v44, %v1150_v58  ;;  %v1222_v62 = vmax.f32 %v1148_v55, 0.0  ;;  %v5139_v44 = vld [vmem:[%s5546_s3 + $0x2] ss:$0 sm:$0xff]  ;;  %4428 = vmatpush3.bf16.msra.mxu0 %v4663_v45 }
 0x24a   : > { %v1225_v61 = vmax.f32 %v1159_v57, 0.0 }
 0x24b   : > { %v1223_v63 = vmax.f32 %v1151_v59, 0.0 }
 0x24c   : > { %v1257_v0 = vpack.c.bf16 %v1225_v61, %v1224_v60 }
 0x24d   : > { %v1256_v1 = vpack.c.bf16 %v1223_v63, %v1222_v62 }
 0x24f   : > { %4329 = vmatprep.mubr.bf16.mxu0 %v1256_v1 }
 0x250   : > { %4330 = vmatmul.mubr.bf16.gmra.mrb[124].mxu0 %v1257_v0 }
 0x2ab   : > { %v4271_v4 = vpop.f32.mrb[64].mxu0 }
 0x2ac   : > { %v1374_v5 = vadd.f32 %v4271_v4, %v5139_v44  ;;  %v1365_v6 = vpop.f32.mrb[65].mxu0 }
 0x2ad   : > { %v1366_v7 = vadd.f32 %v5139_v44, %v1365_v6  ;;  %v4272_v8 = vpop.f32.mrb[66].mxu0 }
 0x2ae   : > { %v1377_v9 = vadd.f32 %v4272_v8, %v5139_v44  ;;  %v1368_v10 = vpop.f32.mrb[67].mxu0  ;;  %v1622_v14 = vmax.f32 %v1374_v5, 0.0 }
 0x2af   : > { %v1369_v13 = vadd.f32 %v5139_v44, %v1368_v10  ;;  %v1620_v16 = vmax.f32 %v1366_v7, 0.0 }
 0x2b0   : > { %v1623_v15 = vmax.f32 %v1377_v9, 0.0 }
 0x2b1   : > { %v1621_v17 = vmax.f32 %v1369_v13, 0.0 }
 0x2b2   : > { %v1685_v18 = vpack.c.bf16 %v1623_v15, %v1622_v14 }
 0x2b3   : > { %v1684_v20 = vpack.c.bf16 %v1621_v17, %v1620_v16  ;;  %v4275_v21 = vpop.f32.mrb[68].mxu0 }
 0x2b4   : > { %v1390_v22 = vadd.f32 %v4275_v21, %v5139_v44  ;;  %v1381_v23 = vpop.f32.mrb[69].mxu0 }
 0x2b5   : > { %v1382_v24 = vadd.f32 %v5139_v44, %v1381_v23  ;;  %v4276_v25 = vpop.f32.mrb[70].mxu0  ;;  %4349 = vmatprep.mubr.bf16.mxu1 %v1684_v20 }
 0x2b6   : > { %v1393_v26 = vadd.f32 %v4276_v25, %v5139_v44  ;;  %v1384_v27 = vpop.f32.mrb[71].mxu0  ;;  %4350 = vmatmul.mubr.bf16.vlgmr.msra.gmra.mrb[64].mxu1 %v1685_v18  ;;  %v1626_v30 = vmax.f32 %v1390_v22, 0.0 }
 0x2b7   : > { %v1385_v29 = vadd.f32 %v5139_v44, %v1384_v27  ;;  %v1624_v32 = vmax.f32 %v1382_v24, 0.0 }
 0x2b8   : > { %v1627_v31 = vmax.f32 %v1393_v26, 0.0 }
 0x2b9   : > { %v1625_v33 = vmax.f32 %v1385_v29, 0.0 }
 0x2ba   : > { %v1687_v34 = vpack.c.bf16 %v1627_v31, %v1626_v30 }
 0x2bb   : > { %v1686_v36 = vpack.c.bf16 %v1625_v33, %v1624_v32  ;;  %v4279_v37 = vpop.f32.mrb[72].mxu0 }
 0x2bc   : > { %v1406_v38 = vadd.f32 %v4279_v37, %v5139_v44  ;;  %v1397_v39 = vpop.f32.mrb[73].mxu0 }
 0x2bd   : > { %v1398_v40 = vadd.f32 %v5139_v44, %v1397_v39  ;;  %v4280_v41 = vpop.f32.mrb[74].mxu0  ;;  %4353 = vmatprep.mubr.bf16.mxu1 %v1686_v36 }
 0x2be   : > { %v1409_v42 = vadd.f32 %v4280_v41, %v5139_v44  ;;  %v1400_v43 = vpop.f32.mrb[75].mxu0  ;;  %4354 = vmatmul.mubr.bf16.gmra.mrb[68].mxu1 %v1687_v34  ;;  %v1630_v47 = vmax.f32 %v1406_v38, 0.0 }
 0x2bf   : > { %v1401_v46 = vadd.f32 %v5139_v44, %v1400_v43  ;;  %v1628_v49 = vmax.f32 %v1398_v40, 0.0 }
 0x2c0   : > { %v1631_v48 = vmax.f32 %v1409_v42, 0.0 }
 0x2c1   : > { %v1629_v50 = vmax.f32 %v1401_v46, 0.0 }
 0x2c2   : > { %v1689_v51 = vpack.c.bf16 %v1631_v48, %v1630_v47 }
 0x2c3   : > { %v1688_v52 = vpack.c.bf16 %v1629_v50, %v1628_v49  ;;  %v4283_v53 = vpop.f32.mrb[76].mxu0 }
 0x2c4   : > { %v1422_v54 = vadd.f32 %v4283_v53, %v5139_v44  ;;  %v1413_v55 = vpop.f32.mrb[77].mxu0 }
 0x2c5   : > { %v1414_v56 = vadd.f32 %v5139_v44, %v1413_v55  ;;  %v4284_v57 = vpop.f32.mrb[78].mxu0  ;;  %4357 = vmatprep.mubr.bf16.mxu1 %v1688_v52 }
 0x2c6   : > { %v1425_v58 = vadd.f32 %v4284_v57, %v5139_v44  ;;  %v1416_v59 = vpop.f32.mrb[79].mxu0  ;;  %4358 = vmatmul.mubr.bf16.gmra.mrb[72].mxu1 %v1689_v51  ;;  %v1634_v61 = vmax.f32 %v1422_v54, 0.0 }
 0x2c7   : > { %v1417_v60 = vadd.f32 %v5139_v44, %v1416_v59  ;;  %v1632_v63 = vmax.f32 %v1414_v56, 0.0 }
 0x2c8   : > { %v1635_v62 = vmax.f32 %v1425_v58, 0.0 }
 0x2c9   : > { %v1633_v0 = vmax.f32 %v1417_v60, 0.0 }
 0x2ca   : > { %v1691_v1 = vpack.c.bf16 %v1635_v62, %v1634_v61 }
 0x2cb   : > { %v1690_v2 = vpack.c.bf16 %v1633_v0, %v1632_v63  ;;  %v4287_v3 = vpop.f32.mrb[80].mxu0 }
 0x2cc   : > { %v1438_v4 = vadd.f32 %v4287_v3, %v5139_v44  ;;  %v1429_v5 = vpop.f32.mrb[81].mxu0 }
 0x2cd   : > { %v1430_v6 = vadd.f32 %v5139_v44, %v1429_v5  ;;  %v4288_v7 = vpop.f32.mrb[82].mxu0  ;;  %4361 = vmatprep.mubr.bf16.mxu1 %v1690_v2 }
 0x2ce   : > { %v1441_v8 = vadd.f32 %v4288_v7, %v5139_v44  ;;  %v1432_v9 = vpop.f32.mrb[83].mxu0  ;;  %4362 = vmatmul.mubr.bf16.gmra.mrb[76].mxu1 %v1691_v1  ;;  %v1638_v11 = vmax.f32 %v1438_v4, 0.0 }
 0x2cf   : > { %v1433_v10 = vadd.f32 %v5139_v44, %v1432_v9  ;;  %v1636_v13 = vmax.f32 %v1430_v6, 0.0 }
 0x2d0   : > { %v1639_v12 = vmax.f32 %v1441_v8, 0.0 }
 0x2d1   : > { %v1637_v14 = vmax.f32 %v1433_v10, 0.0 }
 0x2d2   : > { %v1693_v15 = vpack.c.bf16 %v1639_v12, %v1638_v11 }
 0x2d3   : > { %v1692_v16 = vpack.c.bf16 %v1637_v14, %v1636_v13  ;;  %v4291_v17 = vpop.f32.mrb[84].mxu0 }
 0x2d4   : > { %v1454_v18 = vadd.f32 %v4291_v17, %v5139_v44  ;;  %v1445_v19 = vpop.f32.mrb[85].mxu0 }
 0x2d5   : > { %v1446_v20 = vadd.f32 %v5139_v44, %v1445_v19  ;;  %v4292_v21 = vpop.f32.mrb[86].mxu0  ;;  %4365 = vmatprep.mubr.bf16.mxu1 %v1692_v16 }
 0x2d6   : > { %v1457_v22 = vadd.f32 %v4292_v21, %v5139_v44  ;;  %v1448_v23 = vpop.f32.mrb[87].mxu0  ;;  %4366 = vmatmul.mubr.bf16.gmra.mrb[80].mxu1 %v1693_v15  ;;  %v1642_v25 = vmax.f32 %v1454_v18, 0.0 }
 0x2d7   : > { %v1449_v24 = vadd.f32 %v5139_v44, %v1448_v23  ;;  %v1640_v27 = vmax.f32 %v1446_v20, 0.0 }
 0x2d8   : > { %v1643_v26 = vmax.f32 %v1457_v22, 0.0 }
 0x2d9   : > { %v1641_v28 = vmax.f32 %v1449_v24, 0.0 }
 0x2da   : > { %v1695_v29 = vpack.c.bf16 %v1643_v26, %v1642_v25 }
 0x2db   : > { %v1694_v30 = vpack.c.bf16 %v1641_v28, %v1640_v27  ;;  %v4295_v31 = vpop.f32.mrb[88].mxu0 }
 0x2dc   : > { %v1470_v32 = vadd.f32 %v4295_v31, %v5139_v44  ;;  %v1461_v33 = vpop.f32.mrb[89].mxu0 }
 0x2dd   : > { %v1462_v34 = vadd.f32 %v5139_v44, %v1461_v33  ;;  %v4296_v35 = vpop.f32.mrb[90].mxu0  ;;  %4369 = vmatprep.mubr.bf16.mxu1 %v1694_v30 }
 0x2de   : > { %v1473_v36 = vadd.f32 %v4296_v35, %v5139_v44  ;;  %v1464_v37 = vpop.f32.mrb[91].mxu0  ;;  %4370 = vmatmul.mubr.bf16.gmra.mrb[84].mxu1 %v1695_v29  ;;  %v1646_v39 = vmax.f32 %v1470_v32, 0.0 }
 0x2df   : > { %v1465_v38 = vadd.f32 %v5139_v44, %v1464_v37  ;;  %v1644_v41 = vmax.f32 %v1462_v34, 0.0 }
 0x2e0   : > { %v1647_v40 = vmax.f32 %v1473_v36, 0.0 }
 0x2e1   : > { %v1645_v42 = vmax.f32 %v1465_v38, 0.0 }
 0x2e2   : > { %v1697_v43 = vpack.c.bf16 %v1647_v40, %v1646_v39 }
 0x2e3   : > { %v1696_v45 = vpack.c.bf16 %v1645_v42, %v1644_v41  ;;  %v4299_v46 = vpop.f32.mrb[92].mxu0 }
 0x2e4   : > { %v1486_v47 = vadd.f32 %v4299_v46, %v5139_v44  ;;  %v1477_v48 = vpop.f32.mrb[93].mxu0 }
 0x2e5   : > { %v1478_v49 = vadd.f32 %v5139_v44, %v1477_v48  ;;  %v4300_v50 = vpop.f32.mrb[94].mxu0  ;;  %4373 = vmatprep.mubr.bf16.mxu1 %v1696_v45 }
 0x2e6   : > { %v1489_v51 = vadd.f32 %v4300_v50, %v5139_v44  ;;  %v1480_v52 = vpop.f32.mrb[95].mxu0  ;;  %4374 = vmatmul.mubr.bf16.gmra.mrb[88].mxu1 %v1697_v43  ;;  %v1650_v54 = vmax.f32 %v1486_v47, 0.0 }
 0x2e7   : > { %v1481_v53 = vadd.f32 %v5139_v44, %v1480_v52  ;;  %v1648_v56 = vmax.f32 %v1478_v49, 0.0 }
 0x2e8   : > { %v1651_v55 = vmax.f32 %v1489_v51, 0.0 }
 0x2e9   : > { %v1649_v57 = vmax.f32 %v1481_v53, 0.0 }
 0x2ea   : > { %v1699_v58 = vpack.c.bf16 %v1651_v55, %v1650_v54 }
 0x2eb   : > { %v1698_v59 = vpack.c.bf16 %v1649_v57, %v1648_v56  ;;  %v4303_v60 = vpop.f32.mrb[96].mxu0 }
 0x2ec   : > { %v1502_v61 = vadd.f32 %v4303_v60, %v5139_v44  ;;  %v1493_v62 = vpop.f32.mrb[97].mxu0 }
 0x2ed   : > { %v1494_v63 = vadd.f32 %v5139_v44, %v1493_v62  ;;  %v4304_v0 = vpop.f32.mrb[98].mxu0  ;;  %4377 = vmatprep.mubr.bf16.mxu1 %v1698_v59 }
 0x2ee   : > { %v1505_v1 = vadd.f32 %v4304_v0, %v5139_v44  ;;  %v1496_v2 = vpop.f32.mrb[99].mxu0  ;;  %4378 = vmatmul.mubr.bf16.gmra.mrb[92].mxu1 %v1699_v58  ;;  %v1654_v4 = vmax.f32 %v1502_v61, 0.0 }
 0x2ef   : > { %v1497_v3 = vadd.f32 %v5139_v44, %v1496_v2  ;;  %v1652_v6 = vmax.f32 %v1494_v63, 0.0 }
 0x2f0   : > { %v1655_v5 = vmax.f32 %v1505_v1, 0.0 }
 0x2f1   : > { %v1653_v7 = vmax.f32 %v1497_v3, 0.0 }
 0x2f2   : > { %v1701_v8 = vpack.c.bf16 %v1655_v5, %v1654_v4 }
 0x2f3   : > { %v1700_v9 = vpack.c.bf16 %v1653_v7, %v1652_v6  ;;  %v4307_v10 = vpop.f32.mrb[100].mxu0 }
 0x2f4   : > { %v1518_v11 = vadd.f32 %v4307_v10, %v5139_v44  ;;  %v1509_v12 = vpop.f32.mrb[101].mxu0 }
 0x2f5   : > { %v1510_v13 = vadd.f32 %v5139_v44, %v1509_v12  ;;  %v4308_v14 = vpop.f32.mrb[102].mxu0  ;;  %4381 = vmatprep.mubr.bf16.mxu1 %v1700_v9 }
 0x2f6   : > { %v1521_v15 = vadd.f32 %v4308_v14, %v5139_v44  ;;  %v1512_v16 = vpop.f32.mrb[103].mxu0  ;;  %4382 = vmatmul.mubr.bf16.gmra.mrb[96].mxu1 %v1701_v8  ;;  %v1658_v18 = vmax.f32 %v1518_v11, 0.0 }
 0x2f7   : > { %v1513_v17 = vadd.f32 %v5139_v44, %v1512_v16  ;;  %v1656_v20 = vmax.f32 %v1510_v13, 0.0 }
 0x2f8   : > { %v1659_v19 = vmax.f32 %v1521_v15, 0.0 }
 0x2f9   : > { %v1657_v21 = vmax.f32 %v1513_v17, 0.0 }
 0x2fa   : > { %v1703_v22 = vpack.c.bf16 %v1659_v19, %v1658_v18 }
 0x2fb   : > { %v1702_v23 = vpack.c.bf16 %v1657_v21, %v1656_v20  ;;  %v4311_v24 = vpop.f32.mrb[104].mxu0 }
 0x2fc   : > { %v1534_v25 = vadd.f32 %v4311_v24, %v5139_v44  ;;  %v1525_v26 = vpop.f32.mrb[105].mxu0 }
 0x2fd   : > { %v1526_v27 = vadd.f32 %v5139_v44, %v1525_v26  ;;  %v4312_v28 = vpop.f32.mrb[106].mxu0  ;;  %4385 = vmatprep.mubr.bf16.mxu1 %v1702_v23 }
 0x2fe   : > { %v1537_v29 = vadd.f32 %v4312_v28, %v5139_v44  ;;  %v1528_v30 = vpop.f32.mrb[107].mxu0  ;;  %4386 = vmatmul.mubr.bf16.gmra.mrb[100].mxu1 %v1703_v22  ;;  %v1662_v32 = vmax.f32 %v1534_v25, 0.0 }
 0x2ff   : > { %v1529_v31 = vadd.f32 %v5139_v44, %v1528_v30  ;;  %v1660_v34 = vmax.f32 %v1526_v27, 0.0 }
 0x300   : > { %v1663_v33 = vmax.f32 %v1537_v29, 0.0 }
 0x301   : > { %v1661_v35 = vmax.f32 %v1529_v31, 0.0 }
 0x302   : > { %v1705_v36 = vpack.c.bf16 %v1663_v33, %v1662_v32 }
 0x303   : > { %v1704_v37 = vpack.c.bf16 %v1661_v35, %v1660_v34  ;;  %v4315_v38 = vpop.f32.mrb[108].mxu0 }
 0x304   : > { %v1550_v39 = vadd.f32 %v4315_v38, %v5139_v44  ;;  %v1541_v40 = vpop.f32.mrb[109].mxu0 }
 0x305   : > { %v1542_v41 = vadd.f32 %v5139_v44, %v1541_v40  ;;  %v4316_v42 = vpop.f32.mrb[110].mxu0  ;;  %4389 = vmatprep.mubr.bf16.mxu1 %v1704_v37 }
 0x306   : > { %v1553_v43 = vadd.f32 %v4316_v42, %v5139_v44  ;;  %v1544_v45 = vpop.f32.mrb[111].mxu0  ;;  %4390 = vmatmul.mubr.bf16.gmra.mrb[104].mxu1 %v1705_v36  ;;  %v1666_v47 = vmax.f32 %v1550_v39, 0.0 }
 0x307   : > { %v1545_v46 = vadd.f32 %v5139_v44, %v1544_v45  ;;  %v1664_v49 = vmax.f32 %v1542_v41, 0.0 }
 0x308   : > { %v1667_v48 = vmax.f32 %v1553_v43, 0.0 }
 0x309   : > { %v1665_v50 = vmax.f32 %v1545_v46, 0.0  ;;  %v4664_v46 = vld [vmem:[%s5545_s2 + $0x100] sm:$0xff]  }
 0x30a   : > { %v1707_v51 = vpack.c.bf16 %v1667_v48, %v1666_v47  ;;  %4573 = vmatprep.subr.bf16.mxu1 %v4664_v46  ;;  %4493 = vmatprep.subr.bf16.mxu0 %v4664_v46  ;;  %v5229_v47 = vld [vmem:[%s5546_s3 + $0x3] ss:$0 sm:$0xff]  ;;  %v4665_v48 = vld [vmem:[%s5545_s2 + $0x108] sm:$0xff]  }
 0x30b   : > { %v1706_v52 = vpack.c.bf16 %v1665_v50, %v1664_v49  ;;  %v4319_v53 = vpop.f32.mrb[112].mxu0  ;;  %4581 = vmatpush3.bf16.msra.mxu1 %v4664_v46 }
 0x30c   : > { %v1566_v54 = vadd.f32 %v4319_v53, %v5139_v44  ;;  %v1557_v55 = vpop.f32.mrb[113].mxu0  ;;  %4574 = vmatprep.subr.bf16.mxu1 %v4665_v48 }
 0x30d   : > { %v1558_v56 = vadd.f32 %v5139_v44, %v1557_v55  ;;  %v4320_v57 = vpop.f32.mrb[114].mxu0  ;;  %4393 = vmatprep.mubr.bf16.mxu1 %v1706_v52  ;;  %v4666_v55 = vld [vmem:[%s5545_s2 + $0x110] sm:$0xff]  }
 0x30e   : > { %v1569_v58 = vadd.f32 %v4320_v57, %v5139_v44  ;;  %v1560_v59 = vpop.f32.mrb[115].mxu0  ;;  %4394 = vmatmul.mubr.bf16.gmra.mrb[108].mxu1 %v1707_v51  ;;  %v1670_v61 = vmax.f32 %v1566_v54, 0.0 }
 0x30f   : > { %v1561_v60 = vadd.f32 %v5139_v44, %v1560_v59  ;;  %v1668_v63 = vmax.f32 %v1558_v56, 0.0  ;;  %4582 = vmatpush3.bf16.msra.mxu1 %v4665_v48 }
 0x310   : > { %v1671_v62 = vmax.f32 %v1569_v58, 0.0  ;;  %4575 = vmatprep.subr.bf16.mxu1 %v4666_v55 }
 0x311   : > { %v1669_v0 = vmax.f32 %v1561_v60, 0.0 }
 0x312   : > { %v1709_v1 = vpack.c.bf16 %v1671_v62, %v1670_v61  ;;  %v4667_v61 = vld [vmem:[%s5545_s2 + $0x118] sm:$0xff]  }
 0x313   : > { %v1708_v2 = vpack.c.bf16 %v1669_v0, %v1668_v63  ;;  %v4323_v3 = vpop.f32.mrb[116].mxu0  ;;  %4583 = vmatpush3.bf16.msra.mxu1 %v4666_v55 }
 0x314   : > { %v1582_v4 = vadd.f32 %v4323_v3, %v5139_v44  ;;  %v1573_v5 = vpop.f32.mrb[117].mxu0  ;;  %4576 = vmatprep.subr.bf16.mxu1 %v4667_v61 }
 0x315   : > { %v1574_v6 = vadd.f32 %v5139_v44, %v1573_v5  ;;  %v4324_v7 = vpop.f32.mrb[118].mxu0  ;;  %4397 = vmatprep.mubr.bf16.mxu1 %v1708_v2  ;;  %v4668_v5 = vld [vmem:[%s5545_s2 + $0x120] sm:$0xff]  }
 0x316   : > { %v1585_v8 = vadd.f32 %v4324_v7, %v5139_v44  ;;  %v1576_v9 = vpop.f32.mrb[119].mxu0  ;;  %4398 = vmatmul.mubr.bf16.gmra.mrb[112].mxu1 %v1709_v1  ;;  %v1674_v11 = vmax.f32 %v1582_v4, 0.0 }
 0x317   : > { %v1577_v10 = vadd.f32 %v5139_v44, %v1576_v9  ;;  %v1672_v13 = vmax.f32 %v1574_v6, 0.0  ;;  %4584 = vmatpush3.bf16.msra.mxu1 %v4667_v61 }
 0x318   : > { %v1675_v12 = vmax.f32 %v1585_v8, 0.0  ;;  %4577 = vmatprep.subr.bf16.mxu1 %v4668_v5 }
 0x319   : > { %v1673_v14 = vmax.f32 %v1577_v10, 0.0 }
 0x31a   : > { %v1711_v15 = vpack.c.bf16 %v1675_v12, %v1674_v11 }
 0x31b   : > { %v1710_v16 = vpack.c.bf16 %v1673_v14, %v1672_v13  ;;  %v4327_v17 = vpop.f32.mrb[120].mxu0  ;;  %v4669_v13 = vld [vmem:[%s5545_s2 + $0x128] sm:$0xff]   ;;  %4585 = vmatpush3.bf16.msra.mxu1 %v4668_v5 }
 0x31c   : > { %v1598_v18 = vadd.f32 %v4327_v17, %v5139_v44  ;;  %v1589_v19 = vpop.f32.mrb[121].mxu0  ;;  %4578 = vmatprep.subr.bf16.mxu1 %v4669_v13 }
 0x31d   : > { %v1590_v20 = vadd.f32 %v5139_v44, %v1589_v19  ;;  %v4328_v21 = vpop.f32.mrb[122].mxu0  ;;  %4401 = vmatprep.mubr.bf16.mxu1 %v1710_v16 }
 0x31e   : > { %v1601_v22 = vadd.f32 %v4328_v21, %v5139_v44  ;;  %v1592_v23 = vpop.f32.mrb[123].mxu0  ;;  %4402 = vmatmul.mubr.bf16.gmra.mrb[116].mxu1 %v1711_v15  ;;  %v1678_v25 = vmax.f32 %v1598_v18, 0.0  ;;  %v4670_v21 = vld [vmem:[%s5545_s2 + $0x130] sm:$0xff]  }
 0x31f   : > { %v1593_v24 = vadd.f32 %v5139_v44, %v1592_v23  ;;  %v1676_v27 = vmax.f32 %v1590_v20, 0.0  ;;  %4586 = vmatpush3.bf16.msra.mxu1 %v4669_v13 }
 0x320   : > { %v1679_v26 = vmax.f32 %v1601_v22, 0.0  ;;  %4579 = vmatprep.subr.bf16.mxu1 %v4670_v21 }
 0x321   : > { %v1677_v28 = vmax.f32 %v1593_v24, 0.0 }
 0x322   : > { %v1713_v29 = vpack.c.bf16 %v1679_v26, %v1678_v25 }
 0x323   : > { %v1712_v30 = vpack.c.bf16 %v1677_v28, %v1676_v27  ;;  %v4331_v31 = vpop.f32.mrb[124].mxu0  ;;  %4587 = vmatpush3.bf16.msra.mxu1 %v4670_v21 }
 0x324   : > { %v1614_v32 = vadd.f32 %v4331_v31, %v5139_v44  ;;  %v1605_v33 = vpop.f32.mrb[125].mxu0 }
 0x325   : > { %v1606_v34 = vadd.f32 %v5139_v44, %v1605_v33  ;;  %v4332_v35 = vpop.f32.mrb[126].mxu0  ;;  %4405 = vmatprep.mubr.bf16.mxu1 %v1712_v30 }
 0x326   : > { %v1617_v36 = vadd.f32 %v4332_v35, %v5139_v44  ;;  %v1608_v37 = vpop.f32.mrb[127].mxu0  ;;  %4406 = vmatmul.mubr.bf16.gmra.mrb[120].mxu1 %v1713_v29  ;;  %v1682_v39 = vmax.f32 %v1614_v32, 0.0 }
 0x327   : > { %v1609_v38 = vadd.f32 %v5139_v44, %v1608_v37  ;;  %v1680_v41 = vmax.f32 %v1606_v34, 0.0 }
 0x328   : > { %v1683_v40 = vmax.f32 %v1617_v36, 0.0 }
 0x329   : > { %v1681_v42 = vmax.f32 %v1609_v38, 0.0 }
 0x32a   : > { %v1715_v43 = vpack.c.bf16 %v1683_v40, %v1682_v39 }
 0x32b   : > { %v1714_v45 = vpack.c.bf16 %v1681_v42, %v1680_v41 }
 0x32d   : > { %4409 = vmatprep.mubr.bf16.mxu1 %v1714_v45 }
 0x32e   : > { %4410 = vmatmul.mubr.bf16.gmra.mrb[124].mxu1 %v1715_v43 }
 0x389   : > { %v4351_v44 = vpop.f32.mrb[64].mxu1 }
 0x38a   : > { %v1832_v49 = vadd.f32 %v4351_v44, %v5229_v47  ;;  %v1823_v50 = vpop.f32.mrb[65].mxu1 }
 0x38b   : > { %v1824_v51 = vadd.f32 %v5229_v47, %v1823_v50  ;;  %v4352_v52 = vpop.f32.mrb[66].mxu1 }
 0x38c   : > { %v1835_v53 = vadd.f32 %v4352_v52, %v5229_v47  ;;  %v1826_v54 = vpop.f32.mrb[67].mxu1  ;;  %v2080_v57 = vmax.f32 %v1832_v49, 0.0 }
 0x38d   : > { %v1827_v56 = vadd.f32 %v5229_v47, %v1826_v54  ;;  %v2078_v59 = vmax.f32 %v1824_v51, 0.0 }
 0x38e   : > { %v2081_v58 = vmax.f32 %v1835_v53, 0.0 }
 0x38f   : > { %v2079_v60 = vmax.f32 %v1827_v56, 0.0 }
 0x390   : > { %v2143_v62 = vpack.c.bf16 %v2081_v58, %v2080_v57 }
 0x391   : > { %v2142_v63 = vpack.c.bf16 %v2079_v60, %v2078_v59  ;;  %v4355_v0 = vpop.f32.mrb[68].mxu1 }
 0x392   : > { %v1848_v1 = vadd.f32 %v4355_v0, %v5229_v47  ;;  %v1839_v2 = vpop.f32.mrb[69].mxu1 }
 0x393   : > { %v1840_v3 = vadd.f32 %v5229_v47, %v1839_v2  ;;  %v4356_v4 = vpop.f32.mrb[70].mxu1  ;;  %4429 = vmatprep.mubr.bf16.mxu0 %v2142_v63 }
 0x394   : > { %v1851_v6 = vadd.f32 %v4356_v4, %v5229_v47  ;;  %v1842_v7 = vpop.f32.mrb[71].mxu1  ;;  %4430 = vmatmul.mubr.bf16.vlgmr.msra.gmra.mrb[128].mxu0 %v2143_v62  ;;  %v2084_v9 = vmax.f32 %v1848_v1, 0.0 }
 0x395   : > { %v1843_v8 = vadd.f32 %v5229_v47, %v1842_v7  ;;  %4494 = vmatpush3.bf16.msra.mxu0 %v4664_v46  ;;  %v2082_v11 = vmax.f32 %v1840_v3, 0.0 }
 0x396   : > { %v2085_v10 = vmax.f32 %v1851_v6, 0.0  ;;  %4495 = vmatprep.subr.bf16.mxu0 %v4665_v48 }
 0x397   : > { %v2083_v12 = vmax.f32 %v1843_v8, 0.0 }
 0x398   : > { %v2145_v14 = vpack.c.bf16 %v2085_v10, %v2084_v9 }
 0x399   : > { %v2144_v15 = vpack.c.bf16 %v2083_v12, %v2082_v11  ;;  %v4359_v16 = vpop.f32.mrb[72].mxu1  ;;  %4496 = vmatpush3.bf16.msra.mxu0 %v4665_v48 }
 0x39a   : > { %v1864_v17 = vadd.f32 %v4359_v16, %v5229_v47  ;;  %v1855_v18 = vpop.f32.mrb[73].mxu1  ;;  %4497 = vmatprep.subr.bf16.mxu0 %v4666_v55 }
 0x39b   : > { %v1856_v19 = vadd.f32 %v5229_v47, %v1855_v18  ;;  %v4360_v20 = vpop.f32.mrb[74].mxu1  ;;  %4433 = vmatprep.mubr.bf16.mxu0 %v2144_v15 }
 0x39c   : > { %v1867_v22 = vadd.f32 %v4360_v20, %v5229_v47  ;;  %v1858_v23 = vpop.f32.mrb[75].mxu1  ;;  %4434 = vmatmul.mubr.bf16.gmra.mrb[132].mxu0 %v2145_v14  ;;  %v2088_v25 = vmax.f32 %v1864_v17, 0.0 }
 0x39d   : > { %v1859_v24 = vadd.f32 %v5229_v47, %v1858_v23  ;;  %4498 = vmatpush3.bf16.msra.mxu0 %v4666_v55  ;;  %v2086_v27 = vmax.f32 %v1856_v19, 0.0 }
 0x39e   : > { %v2089_v26 = vmax.f32 %v1867_v22, 0.0  ;;  %4499 = vmatprep.subr.bf16.mxu0 %v4667_v61 }
 0x39f   : > { %v2087_v28 = vmax.f32 %v1859_v24, 0.0 }
 0x3a0   : > { %v2147_v29 = vpack.c.bf16 %v2089_v26, %v2088_v25 }
 0x3a1   : > { %v2146_v30 = vpack.c.bf16 %v2087_v28, %v2086_v27  ;;  %v4363_v31 = vpop.f32.mrb[76].mxu1  ;;  %4500 = vmatpush3.bf16.msra.mxu0 %v4667_v61 }
 0x3a2   : > { %v1880_v32 = vadd.f32 %v4363_v31, %v5229_v47  ;;  %v1871_v33 = vpop.f32.mrb[77].mxu1  ;;  %4501 = vmatprep.subr.bf16.mxu0 %v4668_v5 }
 0x3a3   : > { %v1872_v34 = vadd.f32 %v5229_v47, %v1871_v33  ;;  %v4364_v35 = vpop.f32.mrb[78].mxu1  ;;  %4437 = vmatprep.mubr.bf16.mxu0 %v2146_v30 }
 0x3a4   : > { %v1883_v36 = vadd.f32 %v4364_v35, %v5229_v47  ;;  %v1874_v37 = vpop.f32.mrb[79].mxu1  ;;  %4438 = vmatmul.mubr.bf16.gmra.mrb[136].mxu0 %v2147_v29  ;;  %v2092_v39 = vmax.f32 %v1880_v32, 0.0 }
 0x3a5   : > { %v1875_v38 = vadd.f32 %v5229_v47, %v1874_v37  ;;  %4502 = vmatpush3.bf16.msra.mxu0 %v4668_v5  ;;  %v2090_v41 = vmax.f32 %v1872_v34, 0.0 }
 0x3a6   : > { %v2093_v40 = vmax.f32 %v1883_v36, 0.0  ;;  %4503 = vmatprep.subr.bf16.mxu0 %v4669_v13 }
 0x3a7   : > { %v2091_v42 = vmax.f32 %v1875_v38, 0.0 }
 0x3a8   : > { %v2149_v43 = vpack.c.bf16 %v2093_v40, %v2092_v39 }
 0x3a9   : > { %v2148_v45 = vpack.c.bf16 %v2091_v42, %v2090_v41  ;;  %v4367_v46 = vpop.f32.mrb[80].mxu1  ;;  %4504 = vmatpush3.bf16.msra.mxu0 %v4669_v13 }
 0x3aa   : > { %v1896_v44 = vadd.f32 %v4367_v46, %v5229_v47  ;;  %v1887_v48 = vpop.f32.mrb[81].mxu1  ;;  %4505 = vmatprep.subr.bf16.mxu0 %v4670_v21 }
 0x3ab   : > { %v1888_v49 = vadd.f32 %v5229_v47, %v1887_v48  ;;  %v4368_v50 = vpop.f32.mrb[82].mxu1  ;;  %4441 = vmatprep.mubr.bf16.mxu0 %v2148_v45 }
 0x3ac   : > { %v1899_v51 = vadd.f32 %v4368_v50, %v5229_v47  ;;  %v1890_v52 = vpop.f32.mrb[83].mxu1  ;;  %4442 = vmatmul.mubr.bf16.gmra.mrb[140].mxu0 %v2149_v43  ;;  %v2096_v54 = vmax.f32 %v1896_v44, 0.0 }
 0x3ad   : > { %v1891_v53 = vadd.f32 %v5229_v47, %v1890_v52  ;;  %4506 = vmatpush3.bf16.msra.mxu0 %v4670_v21  ;;  %v2094_v56 = vmax.f32 %v1888_v49, 0.0 }
 0x3ae   : > { %v2097_v55 = vmax.f32 %v1899_v51, 0.0 }
 0x3af   : > { %v2095_v57 = vmax.f32 %v1891_v53, 0.0 }
 0x3b0   : > { %v2151_v58 = vpack.c.bf16 %v2097_v55, %v2096_v54 }
 0x3b1   : > { %v2150_v59 = vpack.c.bf16 %v2095_v57, %v2094_v56  ;;  %v4371_v60 = vpop.f32.mrb[84].mxu1 }
 0x3b2   : > { %v1912_v61 = vadd.f32 %v4371_v60, %v5229_v47  ;;  %v1903_v62 = vpop.f32.mrb[85].mxu1 }
 0x3b3   : > { %v1904_v63 = vadd.f32 %v5229_v47, %v1903_v62  ;;  %v4372_v0 = vpop.f32.mrb[86].mxu1  ;;  %4445 = vmatprep.mubr.bf16.mxu0 %v2150_v59 }
 0x3b4   : > { %v1915_v1 = vadd.f32 %v4372_v0, %v5229_v47  ;;  %v1906_v2 = vpop.f32.mrb[87].mxu1  ;;  %4446 = vmatmul.mubr.bf16.gmra.mrb[144].mxu0 %v2151_v58  ;;  %v2100_v4 = vmax.f32 %v1912_v61, 0.0 }
 0x3b5   : > { %v1907_v3 = vadd.f32 %v5229_v47, %v1906_v2  ;;  %v2098_v6 = vmax.f32 %v1904_v63, 0.0 }
 0x3b6   : > { %v2101_v5 = vmax.f32 %v1915_v1, 0.0 }
 0x3b7   : > { %v2099_v7 = vmax.f32 %v1907_v3, 0.0 }
 0x3b8   : > { %v2153_v8 = vpack.c.bf16 %v2101_v5, %v2100_v4 }
 0x3b9   : > { %v2152_v9 = vpack.c.bf16 %v2099_v7, %v2098_v6  ;;  %v4375_v10 = vpop.f32.mrb[88].mxu1 }
 0x3ba   : > { %v1928_v11 = vadd.f32 %v4375_v10, %v5229_v47  ;;  %v1919_v12 = vpop.f32.mrb[89].mxu1 }
 0x3bb   : > { %v1920_v13 = vadd.f32 %v5229_v47, %v1919_v12  ;;  %v4376_v14 = vpop.f32.mrb[90].mxu1  ;;  %4449 = vmatprep.mubr.bf16.mxu0 %v2152_v9 }
 0x3bc   : > { %v1931_v15 = vadd.f32 %v4376_v14, %v5229_v47  ;;  %v1922_v16 = vpop.f32.mrb[91].mxu1  ;;  %4450 = vmatmul.mubr.bf16.gmra.mrb[148].mxu0 %v2153_v8  ;;  %v2104_v18 = vmax.f32 %v1928_v11, 0.0 }
 0x3bd   : > { %v1923_v17 = vadd.f32 %v5229_v47, %v1922_v16  ;;  %v2102_v20 = vmax.f32 %v1920_v13, 0.0 }
 0x3be   : > { %v2105_v19 = vmax.f32 %v1931_v15, 0.0 }
 0x3bf   : > { %v2103_v21 = vmax.f32 %v1923_v17, 0.0 }
 0x3c0   : > { %v2155_v22 = vpack.c.bf16 %v2105_v19, %v2104_v18 }
 0x3c1   : > { %v2154_v23 = vpack.c.bf16 %v2103_v21, %v2102_v20  ;;  %v4379_v24 = vpop.f32.mrb[92].mxu1 }
 0x3c2   : > { %v1944_v25 = vadd.f32 %v4379_v24, %v5229_v47  ;;  %v1935_v26 = vpop.f32.mrb[93].mxu1 }
 0x3c3   : > { %v1936_v27 = vadd.f32 %v5229_v47, %v1935_v26  ;;  %v4380_v28 = vpop.f32.mrb[94].mxu1  ;;  %4453 = vmatprep.mubr.bf16.mxu0 %v2154_v23 }
 0x3c4   : > { %v1947_v29 = vadd.f32 %v4380_v28, %v5229_v47  ;;  %v1938_v30 = vpop.f32.mrb[95].mxu1  ;;  %4454 = vmatmul.mubr.bf16.gmra.mrb[152].mxu0 %v2155_v22  ;;  %v2108_v32 = vmax.f32 %v1944_v25, 0.0 }
 0x3c5   : > { %v1939_v31 = vadd.f32 %v5229_v47, %v1938_v30  ;;  %v2106_v34 = vmax.f32 %v1936_v27, 0.0 }
 0x3c6   : > { %v2109_v33 = vmax.f32 %v1947_v29, 0.0 }
 0x3c7   : > { %v2107_v35 = vmax.f32 %v1939_v31, 0.0 }
 0x3c8   : > { %v2157_v36 = vpack.c.bf16 %v2109_v33, %v2108_v32 }
 0x3c9   : > { %v2156_v37 = vpack.c.bf16 %v2107_v35, %v2106_v34  ;;  %v4383_v38 = vpop.f32.mrb[96].mxu1 }
 0x3ca   : > { %v1960_v39 = vadd.f32 %v4383_v38, %v5229_v47  ;;  %v1951_v40 = vpop.f32.mrb[97].mxu1  ;;  %v4671_v38 = vld [vmem:[%s5545_s2 + $0x138] sm:$0xff]  }
 0x3cb   : > { %v1952_v41 = vadd.f32 %v5229_v47, %v1951_v40  ;;  %v4384_v42 = vpop.f32.mrb[98].mxu1  ;;  %4457 = vmatprep.mubr.bf16.mxu0 %v2156_v37  ;;  %4580 = vmatprep.subr.bf16.mxu1 %v4671_v38 }
 0x3cc   : > { %v1963_v43 = vadd.f32 %v4384_v42, %v5229_v47  ;;  %v1954_v45 = vpop.f32.mrb[99].mxu1  ;;  %4458 = vmatmul.mubr.bf16.gmra.mrb[156].mxu0 %v2157_v36  ;;  %v2112_v44 = vmax.f32 %v1960_v39, 0.0  ;;  %4507 = vmatprep.subr.bf16.mxu0 %v4671_v38 }
 0x3cd   : > { %v1955_v46 = vadd.f32 %v5229_v47, %v1954_v45  ;;  %v2110_v49 = vmax.f32 %v1952_v41, 0.0  ;;  %4588 = vmatpush3.bf16.msra.mxu1 %v4671_v38  ;;  %4508 = vmatpush3.bf16.msra.mxu0 %v4671_v38 }
 0x3ce   : > { %v2113_v48 = vmax.f32 %v1963_v43, 0.0 }
 0x3cf   : > { %v2111_v50 = vmax.f32 %v1955_v46, 0.0 }
 0x3d0   : > { %v2159_v51 = vpack.c.bf16 %v2113_v48, %v2112_v44 }
 0x3d1   : > { %v2158_v52 = vpack.c.bf16 %v2111_v50, %v2110_v49  ;;  %v4387_v53 = vpop.f32.mrb[100].mxu1 }
 0x3d2   : > { %v1976_v54 = vadd.f32 %v4387_v53, %v5229_v47  ;;  %v1967_v55 = vpop.f32.mrb[101].mxu1 }
 0x3d3   : > { %v1968_v56 = vadd.f32 %v5229_v47, %v1967_v55  ;;  %v4388_v57 = vpop.f32.mrb[102].mxu1  ;;  %4461 = vmatprep.mubr.bf16.mxu0 %v2158_v52 }
 0x3d4   : > { %v1979_v58 = vadd.f32 %v4388_v57, %v5229_v47  ;;  %v1970_v59 = vpop.f32.mrb[103].mxu1  ;;  %4462 = vmatmul.mubr.bf16.gmra.mrb[160].mxu0 %v2159_v51  ;;  %v2116_v61 = vmax.f32 %v1976_v54, 0.0 }
 0x3d5   : > { %v1971_v60 = vadd.f32 %v5229_v47, %v1970_v59  ;;  %v2114_v63 = vmax.f32 %v1968_v56, 0.0 }
 0x3d6   : > { %v2117_v62 = vmax.f32 %v1979_v58, 0.0 }
 0x3d7   : > { %v2115_v0 = vmax.f32 %v1971_v60, 0.0 }
 0x3d8   : > { %v2161_v1 = vpack.c.bf16 %v2117_v62, %v2116_v61 }
 0x3d9   : > { %v2160_v2 = vpack.c.bf16 %v2115_v0, %v2114_v63  ;;  %v4391_v3 = vpop.f32.mrb[104].mxu1 }
 0x3da   : > { %v1992_v4 = vadd.f32 %v4391_v3, %v5229_v47  ;;  %v1983_v5 = vpop.f32.mrb[105].mxu1 }
 0x3db   : > { %v1984_v6 = vadd.f32 %v5229_v47, %v1983_v5  ;;  %v4392_v7 = vpop.f32.mrb[106].mxu1  ;;  %4465 = vmatprep.mubr.bf16.mxu0 %v2160_v2 }
 0x3dc   : > { %v1995_v8 = vadd.f32 %v4392_v7, %v5229_v47  ;;  %v1986_v9 = vpop.f32.mrb[107].mxu1  ;;  %4466 = vmatmul.mubr.bf16.gmra.mrb[164].mxu0 %v2161_v1  ;;  %v2120_v11 = vmax.f32 %v1992_v4, 0.0 }
 0x3dd   : > { %v1987_v10 = vadd.f32 %v5229_v47, %v1986_v9  ;;  %v2118_v13 = vmax.f32 %v1984_v6, 0.0 }
 0x3de   : > { %v2121_v12 = vmax.f32 %v1995_v8, 0.0 }
 0x3df   : > { %v2119_v14 = vmax.f32 %v1987_v10, 0.0 }
 0x3e0   : > { %v2163_v15 = vpack.c.bf16 %v2121_v12, %v2120_v11 }
 0x3e1   : > { %v2162_v16 = vpack.c.bf16 %v2119_v14, %v2118_v13  ;;  %v4395_v17 = vpop.f32.mrb[108].mxu1 }
 0x3e2   : > { %v2008_v18 = vadd.f32 %v4395_v17, %v5229_v47  ;;  %v1999_v19 = vpop.f32.mrb[109].mxu1 }
 0x3e3   : > { %v2000_v20 = vadd.f32 %v5229_v47, %v1999_v19  ;;  %v4396_v21 = vpop.f32.mrb[110].mxu1  ;;  %4469 = vmatprep.mubr.bf16.mxu0 %v2162_v16 }
 0x3e4   : > { %v2011_v22 = vadd.f32 %v4396_v21, %v5229_v47  ;;  %v2002_v23 = vpop.f32.mrb[111].mxu1  ;;  %4470 = vmatmul.mubr.bf16.gmra.mrb[168].mxu0 %v2163_v15  ;;  %v2124_v25 = vmax.f32 %v2008_v18, 0.0 }
 0x3e5   : > { %v2003_v24 = vadd.f32 %v5229_v47, %v2002_v23  ;;  %v2122_v27 = vmax.f32 %v2000_v20, 0.0 }
 0x3e6   : > { %v2125_v26 = vmax.f32 %v2011_v22, 0.0 }
 0x3e7   : > { %v2123_v28 = vmax.f32 %v2003_v24, 0.0 }
 0x3e8   : > { %v2165_v29 = vpack.c.bf16 %v2125_v26, %v2124_v25  ;;  %v5319_v25 = vld [vmem:[%s5546_s3 + $0x4] ss:$0 sm:$0xff] }
 0x3e9   : > { %v2164_v30 = vpack.c.bf16 %v2123_v28, %v2122_v27  ;;  %v4399_v31 = vpop.f32.mrb[112].mxu1 }
 0x3ea   : > { %v2024_v32 = vadd.f32 %v4399_v31, %v5229_v47  ;;  %v2015_v33 = vpop.f32.mrb[113].mxu1 }
 0x3eb   : > { %v2016_v34 = vadd.f32 %v5229_v47, %v2015_v33  ;;  %v4400_v35 = vpop.f32.mrb[114].mxu1  ;;  %4473 = vmatprep.mubr.bf16.mxu0 %v2164_v30 }
 0x3ec   : > { %v2027_v36 = vadd.f32 %v4400_v35, %v5229_v47  ;;  %v2018_v37 = vpop.f32.mrb[115].mxu1  ;;  %4474 = vmatmul.mubr.bf16.gmra.mrb[172].mxu0 %v2165_v29  ;;  %v2128_v40 = vmax.f32 %v2024_v32, 0.0 }
 0x3ed   : > { %v2019_v39 = vadd.f32 %v5229_v47, %v2018_v37  ;;  %v2126_v42 = vmax.f32 %v2016_v34, 0.0 }
 0x3ee   : > { %v2129_v41 = vmax.f32 %v2027_v36, 0.0 }
 0x3ef   : > { %v2127_v43 = vmax.f32 %v2019_v39, 0.0 }
 0x3f0   : > { %v2167_v45 = vpack.c.bf16 %v2129_v41, %v2128_v40 }
 0x3f1   : > { %v2166_v46 = vpack.c.bf16 %v2127_v43, %v2126_v42  ;;  %v4403_v44 = vpop.f32.mrb[116].mxu1 }
 0x3f2   : > { %v2040_v48 = vadd.f32 %v4403_v44, %v5229_v47  ;;  %v2031_v49 = vpop.f32.mrb[117].mxu1 }
 0x3f3   : > { %v2032_v50 = vadd.f32 %v5229_v47, %v2031_v49  ;;  %v4404_v51 = vpop.f32.mrb[118].mxu1  ;;  %4477 = vmatprep.mubr.bf16.mxu0 %v2166_v46 }
 0x3f4   : > { %v2043_v52 = vadd.f32 %v4404_v51, %v5229_v47  ;;  %v2034_v53 = vpop.f32.mrb[119].mxu1  ;;  %4478 = vmatmul.mubr.bf16.gmra.mrb[176].mxu0 %v2167_v45  ;;  %v2132_v55 = vmax.f32 %v2040_v48, 0.0 }
 0x3f5   : > { %v2035_v54 = vadd.f32 %v5229_v47, %v2034_v53  ;;  %v2130_v57 = vmax.f32 %v2032_v50, 0.0 }
 0x3f6   : > { %v2133_v56 = vmax.f32 %v2043_v52, 0.0 }
 0x3f7   : > { %v2131_v58 = vmax.f32 %v2035_v54, 0.0 }
 0x3f8   : > { %v2169_v59 = vpack.c.bf16 %v2133_v56, %v2132_v55 }
 0x3f9   : > { %v2168_v60 = vpack.c.bf16 %v2131_v58, %v2130_v57  ;;  %v4407_v61 = vpop.f32.mrb[120].mxu1 }
 0x3fa   : > { %v2056_v62 = vadd.f32 %v4407_v61, %v5229_v47  ;;  %v2047_v63 = vpop.f32.mrb[121].mxu1 }
 0x3fb   : > { %v2048_v0 = vadd.f32 %v5229_v47, %v2047_v63  ;;  %v4408_v1 = vpop.f32.mrb[122].mxu1  ;;  %4481 = vmatprep.mubr.bf16.mxu0 %v2168_v60 }
 0x3fc   : > { %v2059_v2 = vadd.f32 %v4408_v1, %v5229_v47  ;;  %v2050_v3 = vpop.f32.mrb[123].mxu1  ;;  %4482 = vmatmul.mubr.bf16.gmra.mrb[180].mxu0 %v2169_v59  ;;  %v2136_v5 = vmax.f32 %v2056_v62, 0.0 }
 0x3fd   : > { %v2051_v4 = vadd.f32 %v5229_v47, %v2050_v3  ;;  %v2134_v7 = vmax.f32 %v2048_v0, 0.0 }
 0x3fe   : > { %v2137_v6 = vmax.f32 %v2059_v2, 0.0 }
 0x3ff   : > { %v2135_v8 = vmax.f32 %v2051_v4, 0.0 }
 0x400   : > { %v2171_v9 = vpack.c.bf16 %v2137_v6, %v2136_v5 }
 0x401   : > { %v2170_v10 = vpack.c.bf16 %v2135_v8, %v2134_v7  ;;  %v4411_v11 = vpop.f32.mrb[124].mxu1 }
 0x402   : > { %v2072_v12 = vadd.f32 %v4411_v11, %v5229_v47  ;;  %v2063_v13 = vpop.f32.mrb[125].mxu1 }
 0x403   : > { %v2064_v14 = vadd.f32 %v5229_v47, %v2063_v13  ;;  %v4412_v15 = vpop.f32.mrb[126].mxu1  ;;  %4485 = vmatprep.mubr.bf16.mxu0 %v2170_v10 }
 0x404   : > { %v2075_v16 = vadd.f32 %v4412_v15, %v5229_v47  ;;  %v2066_v17 = vpop.f32.mrb[127].mxu1  ;;  %4486 = vmatmul.mubr.bf16.gmra.mrb[184].mxu0 %v2171_v9  ;;  %v2140_v19 = vmax.f32 %v2072_v12, 0.0 }
 0x405   : > { %v2067_v18 = vadd.f32 %v5229_v47, %v2066_v17  ;;  %v2138_v21 = vmax.f32 %v2064_v14, 0.0 }
 0x406   : > { %v2141_v20 = vmax.f32 %v2075_v16, 0.0 }
 0x407   : > { %v2139_v22 = vmax.f32 %v2067_v18, 0.0 }
 0x408   : > { %v2173_v23 = vpack.c.bf16 %v2141_v20, %v2140_v19 }
 0x409   : > { %v2172_v24 = vpack.c.bf16 %v2139_v22, %v2138_v21 }
 0x40b   : > { %4489 = vmatprep.mubr.bf16.mxu0 %v2172_v24 }
 0x40c   : > { %4490 = vmatmul.mubr.bf16.gmra.mrb[188].mxu0 %v2173_v23 }
 0x467   : > { %v4431_v26 = vpop.f32.mrb[128].mxu0 }
 0x468   : > { %v2290_v27 = vadd.f32 %v4431_v26, %v5319_v25  ;;  %v2281_v28 = vpop.f32.mrb[129].mxu0 }
 0x469   : > { %v2282_v29 = vadd.f32 %v5319_v25, %v2281_v28  ;;  %v4432_v47 = vpop.f32.mrb[130].mxu0 }
 0x46a   : > { %v2293_v30 = vadd.f32 %v4432_v47, %v5319_v25  ;;  %v2284_v31 = vpop.f32.mrb[131].mxu0  ;;  %v2538_v33 = vmax.f32 %v2290_v27, 0.0 }
 0x46b   : > { %v2285_v32 = vadd.f32 %v5319_v25, %v2284_v31  ;;  %v2536_v35 = vmax.f32 %v2282_v29, 0.0 }
 0x46c   : > { %v2539_v34 = vmax.f32 %v2293_v30, 0.0 }
 0x46d   : > { %v2537_v36 = vmax.f32 %v2285_v32, 0.0 }
 0x46e   : > { %v2601_v37 = vpack.c.bf16 %v2539_v34, %v2538_v33 }
 0x46f   : > { %v2600_v38 = vpack.c.bf16 %v2537_v36, %v2536_v35  ;;  %v4435_v39 = vpop.f32.mrb[132].mxu0 }
 0x470   : > { %v2306_v40 = vadd.f32 %v4435_v39, %v5319_v25  ;;  %v2297_v41 = vpop.f32.mrb[133].mxu0 }
 0x471   : > { %v2298_v42 = vadd.f32 %v5319_v25, %v2297_v41  ;;  %v4436_v43 = vpop.f32.mrb[134].mxu0  ;;  %4509 = vmatprep.mubr.bf16.mxu0 %v2600_v38 }
 0x472   : > { %v2309_v45 = vadd.f32 %v4436_v43, %v5319_v25  ;;  %v2300_v46 = vpop.f32.mrb[135].mxu0  ;;  %4510 = vmatmul.mubr.bf16.vlgmr.msra.gmra.mrb[192].mxu0 %v2601_v37  ;;  %v2542_v48 = vmax.f32 %v2306_v40, 0.0 }
 0x473   : > { %v2301_v44 = vadd.f32 %v5319_v25, %v2300_v46  ;;  %v2540_v50 = vmax.f32 %v2298_v42, 0.0 }
 0x474   : > { %v2543_v49 = vmax.f32 %v2309_v45, 0.0 }
 0x475   : > { %v2541_v51 = vmax.f32 %v2301_v44, 0.0 }
 0x476   : > { %v2603_v52 = vpack.c.bf16 %v2543_v49, %v2542_v48 }
 0x477   : > { %v2602_v53 = vpack.c.bf16 %v2541_v51, %v2540_v50  ;;  %v4439_v54 = vpop.f32.mrb[136].mxu0 }
 0x478   : > { %v2322_v55 = vadd.f32 %v4439_v54, %v5319_v25  ;;  %v2313_v56 = vpop.f32.mrb[137].mxu0 }
 0x479   : > { %v2314_v57 = vadd.f32 %v5319_v25, %v2313_v56  ;;  %v4440_v58 = vpop.f32.mrb[138].mxu0  ;;  %4513 = vmatprep.mubr.bf16.mxu1 %v2602_v53 }
 0x47a   : > { %v2325_v59 = vadd.f32 %v4440_v58, %v5319_v25  ;;  %v2316_v60 = vpop.f32.mrb[139].mxu0  ;;  %4514 = vmatmul.mubr.bf16.vlgmr.msra.gmra.mrb[128].mxu1 %v2603_v52  ;;  %v2546_v62 = vmax.f32 %v2322_v55, 0.0 }
 0x47b   : > { %v2317_v61 = vadd.f32 %v5319_v25, %v2316_v60  ;;  %v2544_v0 = vmax.f32 %v2314_v57, 0.0 }
 0x47c   : > { %v2547_v63 = vmax.f32 %v2325_v59, 0.0 }
 0x47d   : > { %v2545_v1 = vmax.f32 %v2317_v61, 0.0 }
 0x47e   : > { %v2605_v2 = vpack.c.bf16 %v2547_v63, %v2546_v62 }
 0x47f   : > { %v2604_v3 = vpack.c.bf16 %v2545_v1, %v2544_v0  ;;  %v4443_v4 = vpop.f32.mrb[140].mxu0 }
 0x480   : > { %v2338_v5 = vadd.f32 %v4443_v4, %v5319_v25  ;;  %v2329_v6 = vpop.f32.mrb[141].mxu0 }
 0x481   : > { %v2330_v7 = vadd.f32 %v5319_v25, %v2329_v6  ;;  %v4444_v8 = vpop.f32.mrb[142].mxu0  ;;  %4517 = vmatprep.mubr.bf16.mxu1 %v2604_v3 }
 0x482   : > { %v2341_v9 = vadd.f32 %v4444_v8, %v5319_v25  ;;  %v2332_v10 = vpop.f32.mrb[143].mxu0  ;;  %4518 = vmatmul.mubr.bf16.gmra.mrb[132].mxu1 %v2605_v2  ;;  %v2550_v12 = vmax.f32 %v2338_v5, 0.0 }
 0x483   : > { %v2333_v11 = vadd.f32 %v5319_v25, %v2332_v10  ;;  %v2548_v14 = vmax.f32 %v2330_v7, 0.0 }
 0x484   : > { %v2551_v13 = vmax.f32 %v2341_v9, 0.0 }
 0x485   : > { %v2549_v15 = vmax.f32 %v2333_v11, 0.0 }
 0x486   : > { %v2607_v16 = vpack.c.bf16 %v2551_v13, %v2550_v12 }
 0x487   : > { %v2606_v17 = vpack.c.bf16 %v2549_v15, %v2548_v14  ;;  %v4447_v18 = vpop.f32.mrb[144].mxu0 }
 0x488   : > { %v2354_v19 = vadd.f32 %v4447_v18, %v5319_v25  ;;  %v2345_v20 = vpop.f32.mrb[145].mxu0 }
 0x489   : > { %v2346_v21 = vadd.f32 %v5319_v25, %v2345_v20  ;;  %v4448_v22 = vpop.f32.mrb[146].mxu0  ;;  %4521 = vmatprep.mubr.bf16.mxu1 %v2606_v17 }
 0x48a   : > { %v2357_v23 = vadd.f32 %v4448_v22, %v5319_v25  ;;  %v2348_v24 = vpop.f32.mrb[147].mxu0  ;;  %4522 = vmatmul.mubr.bf16.gmra.mrb[136].mxu1 %v2607_v16  ;;  %v2554_v27 = vmax.f32 %v2354_v19, 0.0 }
 0x48b   : > { %v2349_v26 = vadd.f32 %v5319_v25, %v2348_v24  ;;  %v2552_v29 = vmax.f32 %v2346_v21, 0.0 }
 0x48c   : > { %v2555_v28 = vmax.f32 %v2357_v23, 0.0 }
 0x48d   : > { %v2553_v47 = vmax.f32 %v2349_v26, 0.0 }
 0x48e   : > { %v2609_v30 = vpack.c.bf16 %v2555_v28, %v2554_v27 }
 0x48f   : > { %v2608_v31 = vpack.c.bf16 %v2553_v47, %v2552_v29  ;;  %v4451_v32 = vpop.f32.mrb[148].mxu0 }
 0x490   : > { %v2370_v33 = vadd.f32 %v4451_v32, %v5319_v25  ;;  %v2361_v34 = vpop.f32.mrb[149].mxu0 }
 0x491   : > { %v2362_v35 = vadd.f32 %v5319_v25, %v2361_v34  ;;  %v4452_v36 = vpop.f32.mrb[150].mxu0  ;;  %4525 = vmatprep.mubr.bf16.mxu1 %v2608_v31 }
 0x492   : > { %v2373_v37 = vadd.f32 %v4452_v36, %v5319_v25  ;;  %v2364_v38 = vpop.f32.mrb[151].mxu0  ;;  %4526 = vmatmul.mubr.bf16.gmra.mrb[140].mxu1 %v2609_v30  ;;  %v2558_v40 = vmax.f32 %v2370_v33, 0.0 }
 0x493   : > { %v2365_v39 = vadd.f32 %v5319_v25, %v2364_v38  ;;  %v2556_v42 = vmax.f32 %v2362_v35, 0.0 }
 0x494   : > { %v2559_v41 = vmax.f32 %v2373_v37, 0.0 }
 0x495   : > { %v2557_v43 = vmax.f32 %v2365_v39, 0.0 }
 0x496   : > { %v2611_v45 = vpack.c.bf16 %v2559_v41, %v2558_v40 }
 0x497   : > { %v2610_v46 = vpack.c.bf16 %v2557_v43, %v2556_v42  ;;  %v4455_v44 = vpop.f32.mrb[152].mxu0 }
 0x498   : > { %v2386_v48 = vadd.f32 %v4455_v44, %v5319_v25  ;;  %v2377_v49 = vpop.f32.mrb[153].mxu0 }
 0x499   : > { %v2378_v50 = vadd.f32 %v5319_v25, %v2377_v49  ;;  %v4456_v51 = vpop.f32.mrb[154].mxu0  ;;  %4529 = vmatprep.mubr.bf16.mxu1 %v2610_v46 }
 0x49a   : > { %v2389_v52 = vadd.f32 %v4456_v51, %v5319_v25  ;;  %v2380_v53 = vpop.f32.mrb[155].mxu0  ;;  %4530 = vmatmul.mubr.bf16.gmra.mrb[144].mxu1 %v2611_v45  ;;  %v2562_v55 = vmax.f32 %v2386_v48, 0.0 }
 0x49b   : > { %v2381_v54 = vadd.f32 %v5319_v25, %v2380_v53  ;;  %v2560_v57 = vmax.f32 %v2378_v50, 0.0 }
 0x49c   : > { %v2563_v56 = vmax.f32 %v2389_v52, 0.0 }
 0x49d   : > { %v2561_v58 = vmax.f32 %v2381_v54, 0.0 }
 0x49e   : > { %v2613_v59 = vpack.c.bf16 %v2563_v56, %v2562_v55 }
 0x49f   : > { %v2612_v60 = vpack.c.bf16 %v2561_v58, %v2560_v57  ;;  %v4459_v61 = vpop.f32.mrb[156].mxu0 }
 0x4a0   : > { %v2402_v62 = vadd.f32 %v4459_v61, %v5319_v25  ;;  %v2393_v63 = vpop.f32.mrb[157].mxu0 }
 0x4a1   : > { %v2394_v0 = vadd.f32 %v5319_v25, %v2393_v63  ;;  %v4460_v1 = vpop.f32.mrb[158].mxu0  ;;  %4533 = vmatprep.mubr.bf16.mxu1 %v2612_v60 }
 0x4a2   : > { %v2405_v2 = vadd.f32 %v4460_v1, %v5319_v25  ;;  %v2396_v3 = vpop.f32.mrb[159].mxu0  ;;  %4534 = vmatmul.mubr.bf16.gmra.mrb[148].mxu1 %v2613_v59  ;;  %v2566_v5 = vmax.f32 %v2402_v62, 0.0 }
 0x4a3   : > { %v2397_v4 = vadd.f32 %v5319_v25, %v2396_v3  ;;  %v2564_v7 = vmax.f32 %v2394_v0, 0.0 }
 0x4a4   : > { %v2567_v6 = vmax.f32 %v2405_v2, 0.0 }
 0x4a5   : > { %v2565_v8 = vmax.f32 %v2397_v4, 0.0 }
 0x4a6   : > { %v2615_v9 = vpack.c.bf16 %v2567_v6, %v2566_v5 }
 0x4a7   : > { %v2614_v10 = vpack.c.bf16 %v2565_v8, %v2564_v7  ;;  %v4463_v11 = vpop.f32.mrb[160].mxu0 }
 0x4a8   : > { %v2418_v12 = vadd.f32 %v4463_v11, %v5319_v25  ;;  %v2409_v13 = vpop.f32.mrb[161].mxu0 }
 0x4a9   : > { %v2410_v14 = vadd.f32 %v5319_v25, %v2409_v13  ;;  %v4464_v15 = vpop.f32.mrb[162].mxu0  ;;  %4537 = vmatprep.mubr.bf16.mxu1 %v2614_v10 }
 0x4aa   : > { %v2421_v16 = vadd.f32 %v4464_v15, %v5319_v25  ;;  %v2412_v17 = vpop.f32.mrb[163].mxu0  ;;  %4538 = vmatmul.mubr.bf16.gmra.mrb[152].mxu1 %v2615_v9  ;;  %v2570_v19 = vmax.f32 %v2418_v12, 0.0 }
 0x4ab   : > { %v2413_v18 = vadd.f32 %v5319_v25, %v2412_v17  ;;  %v2568_v21 = vmax.f32 %v2410_v14, 0.0 }
 0x4ac   : > { %v2571_v20 = vmax.f32 %v2421_v16, 0.0 }
 0x4ad   : > { %v2569_v22 = vmax.f32 %v2413_v18, 0.0 }
 0x4ae   : > { %v2617_v23 = vpack.c.bf16 %v2571_v20, %v2570_v19 }
 0x4af   : > { %v2616_v24 = vpack.c.bf16 %v2569_v22, %v2568_v21  ;;  %v4467_v26 = vpop.f32.mrb[164].mxu0 }
 0x4b0   : > { %v2434_v27 = vadd.f32 %v4467_v26, %v5319_v25  ;;  %v2425_v28 = vpop.f32.mrb[165].mxu0 }
 0x4b1   : > { %v2426_v29 = vadd.f32 %v5319_v25, %v2425_v28  ;;  %v4468_v47 = vpop.f32.mrb[166].mxu0  ;;  %4541 = vmatprep.mubr.bf16.mxu1 %v2616_v24 }
 0x4b2   : > { %v2437_v30 = vadd.f32 %v4468_v47, %v5319_v25  ;;  %v2428_v31 = vpop.f32.mrb[167].mxu0  ;;  %4542 = vmatmul.mubr.bf16.gmra.mrb[156].mxu1 %v2617_v23  ;;  %v2574_v33 = vmax.f32 %v2434_v27, 0.0 }
 0x4b3   : > { %v2429_v32 = vadd.f32 %v5319_v25, %v2428_v31  ;;  %v2572_v35 = vmax.f32 %v2426_v29, 0.0 }
 0x4b4   : > { %v2575_v34 = vmax.f32 %v2437_v30, 0.0 }
 0x4b5   : > { %v2573_v36 = vmax.f32 %v2429_v32, 0.0 }
 0x4b6   : > { %v2619_v37 = vpack.c.bf16 %v2575_v34, %v2574_v33 }
 0x4b7   : > { %v2618_v38 = vpack.c.bf16 %v2573_v36, %v2572_v35  ;;  %v4471_v39 = vpop.f32.mrb[168].mxu0 }
 0x4b8   : > { %v2450_v40 = vadd.f32 %v4471_v39, %v5319_v25  ;;  %v2441_v41 = vpop.f32.mrb[169].mxu0 }
 0x4b9   : > { %v2442_v42 = vadd.f32 %v5319_v25, %v2441_v41  ;;  %v4472_v43 = vpop.f32.mrb[170].mxu0  ;;  %4545 = vmatprep.mubr.bf16.mxu1 %v2618_v38 }
 0x4ba   : > { %v2453_v45 = vadd.f32 %v4472_v43, %v5319_v25  ;;  %v2444_v46 = vpop.f32.mrb[171].mxu0  ;;  %4546 = vmatmul.mubr.bf16.gmra.mrb[160].mxu1 %v2619_v37  ;;  %v2578_v48 = vmax.f32 %v2450_v40, 0.0 }
 0x4bb   : > { %v2445_v44 = vadd.f32 %v5319_v25, %v2444_v46  ;;  %v2576_v50 = vmax.f32 %v2442_v42, 0.0 }
 0x4bc   : > { %v2579_v49 = vmax.f32 %v2453_v45, 0.0 }
 0x4bd   : > { %v2577_v51 = vmax.f32 %v2445_v44, 0.0 }
 0x4be   : > { %v2621_v52 = vpack.c.bf16 %v2579_v49, %v2578_v48 }
 0x4bf   : > { %v2620_v53 = vpack.c.bf16 %v2577_v51, %v2576_v50  ;;  %v4475_v54 = vpop.f32.mrb[172].mxu0 }
 0x4c0   : > { %v2466_v55 = vadd.f32 %v4475_v54, %v5319_v25  ;;  %v2457_v56 = vpop.f32.mrb[173].mxu0 }
 0x4c1   : > { %v2458_v57 = vadd.f32 %v5319_v25, %v2457_v56  ;;  %v4476_v58 = vpop.f32.mrb[174].mxu0  ;;  %4549 = vmatprep.mubr.bf16.mxu1 %v2620_v53 }
 0x4c2   : > { %v2469_v59 = vadd.f32 %v4476_v58, %v5319_v25  ;;  %v2460_v60 = vpop.f32.mrb[175].mxu0  ;;  %4550 = vmatmul.mubr.bf16.gmra.mrb[164].mxu1 %v2621_v52  ;;  %v2582_v62 = vmax.f32 %v2466_v55, 0.0 }
 0x4c3   : > { %v2461_v61 = vadd.f32 %v5319_v25, %v2460_v60  ;;  %v2580_v0 = vmax.f32 %v2458_v57, 0.0 }
 0x4c4   : > { %v2583_v63 = vmax.f32 %v2469_v59, 0.0 }
 0x4c5   : > { %v2581_v1 = vmax.f32 %v2461_v61, 0.0 }
 0x4c6   : > { %v2623_v2 = vpack.c.bf16 %v2583_v63, %v2582_v62  ;;  %v5389_v62 = vld [vmem:[%s5546_s3 + $0x5] ss:$0 sm:$0xff] }
 0x4c7   : > { %v2622_v3 = vpack.c.bf16 %v2581_v1, %v2580_v0  ;;  %v4479_v4 = vpop.f32.mrb[176].mxu0 }
 0x4c8   : > { %v2482_v5 = vadd.f32 %v4479_v4, %v5319_v25  ;;  %v2473_v6 = vpop.f32.mrb[177].mxu0 }
 0x4c9   : > { %v2474_v7 = vadd.f32 %v5319_v25, %v2473_v6  ;;  %v4480_v8 = vpop.f32.mrb[178].mxu0  ;;  %4553 = vmatprep.mubr.bf16.mxu1 %v2622_v3 }
 0x4ca   : > { %v2485_v9 = vadd.f32 %v4480_v8, %v5319_v25  ;;  %v2476_v10 = vpop.f32.mrb[179].mxu0  ;;  %4554 = vmatmul.mubr.bf16.gmra.mrb[168].mxu1 %v2623_v2  ;;  %v2586_v12 = vmax.f32 %v2482_v5, 0.0 }
 0x4cb   : > { %v2477_v11 = vadd.f32 %v5319_v25, %v2476_v10  ;;  %v2584_v14 = vmax.f32 %v2474_v7, 0.0 }
 0x4cc   : > { %v2587_v13 = vmax.f32 %v2485_v9, 0.0 }
 0x4cd   : > { %v2585_v15 = vmax.f32 %v2477_v11, 0.0 }
 0x4ce   : > { %v2625_v16 = vpack.c.bf16 %v2587_v13, %v2586_v12 }
 0x4cf   : > { %v2624_v17 = vpack.c.bf16 %v2585_v15, %v2584_v14  ;;  %v4483_v18 = vpop.f32.mrb[180].mxu0 }
 0x4d0   : > { %v2498_v19 = vadd.f32 %v4483_v18, %v5319_v25  ;;  %v2489_v20 = vpop.f32.mrb[181].mxu0 }
 0x4d1   : > { %v2490_v21 = vadd.f32 %v5319_v25, %v2489_v20  ;;  %v4484_v22 = vpop.f32.mrb[182].mxu0  ;;  %4557 = vmatprep.mubr.bf16.mxu1 %v2624_v17 }
 0x4d2   : > { %v2501_v23 = vadd.f32 %v4484_v22, %v5319_v25  ;;  %v2492_v24 = vpop.f32.mrb[183].mxu0  ;;  %4558 = vmatmul.mubr.bf16.gmra.mrb[172].mxu1 %v2625_v16  ;;  %v2590_v27 = vmax.f32 %v2498_v19, 0.0 }
 0x4d3   : > { %v2493_v26 = vadd.f32 %v5319_v25, %v2492_v24  ;;  %v2588_v29 = vmax.f32 %v2490_v21, 0.0 }
 0x4d4   : > { %v2591_v28 = vmax.f32 %v2501_v23, 0.0 }
 0x4d5   : > { %v2589_v47 = vmax.f32 %v2493_v26, 0.0 }
 0x4d6   : > { %v2627_v30 = vpack.c.bf16 %v2591_v28, %v2590_v27 }
 0x4d7   : > { %v2626_v31 = vpack.c.bf16 %v2589_v47, %v2588_v29  ;;  %v4487_v32 = vpop.f32.mrb[184].mxu0 }
 0x4d8   : > { %v2514_v33 = vadd.f32 %v4487_v32, %v5319_v25  ;;  %v2505_v34 = vpop.f32.mrb[185].mxu0 }
 0x4d9   : > { %v2506_v35 = vadd.f32 %v5319_v25, %v2505_v34  ;;  %v4488_v36 = vpop.f32.mrb[186].mxu0  ;;  %4561 = vmatprep.mubr.bf16.mxu1 %v2626_v31 }
 0x4da   : > { %v2517_v37 = vadd.f32 %v4488_v36, %v5319_v25  ;;  %v2508_v38 = vpop.f32.mrb[187].mxu0  ;;  %4562 = vmatmul.mubr.bf16.gmra.mrb[176].mxu1 %v2627_v30  ;;  %v2594_v40 = vmax.f32 %v2514_v33, 0.0 }
 0x4db   : > { %v2509_v39 = vadd.f32 %v5319_v25, %v2508_v38  ;;  %v2592_v42 = vmax.f32 %v2506_v35, 0.0 }
 0x4dc   : > { %v2595_v41 = vmax.f32 %v2517_v37, 0.0 }
 0x4dd   : > { %v2593_v43 = vmax.f32 %v2509_v39, 0.0 }
 0x4de   : > { %v2629_v45 = vpack.c.bf16 %v2595_v41, %v2594_v40 }
 0x4df   : > { %v2628_v46 = vpack.c.bf16 %v2593_v43, %v2592_v42  ;;  %v4491_v44 = vpop.f32.mrb[188].mxu0 }
 0x4e0   : > { %v2530_v48 = vadd.f32 %v4491_v44, %v5319_v25  ;;  %v2521_v49 = vpop.f32.mrb[189].mxu0 }
 0x4e1   : > { %v2522_v50 = vadd.f32 %v5319_v25, %v2521_v49  ;;  %v4492_v51 = vpop.f32.mrb[190].mxu0  ;;  %4565 = vmatprep.mubr.bf16.mxu1 %v2628_v46 }
 0x4e2   : > { %v2533_v52 = vadd.f32 %v4492_v51, %v5319_v25  ;;  %v2524_v53 = vpop.f32.mrb[191].mxu0  ;;  %4566 = vmatmul.mubr.bf16.gmra.mrb[180].mxu1 %v2629_v45  ;;  %v2598_v55 = vmax.f32 %v2530_v48, 0.0 }
 0x4e3   : > { %v2525_v54 = vadd.f32 %v5319_v25, %v2524_v53  ;;  %v2596_v57 = vmax.f32 %v2522_v50, 0.0 }
 0x4e4   : > { %v2599_v56 = vmax.f32 %v2533_v52, 0.0 }
 0x4e5   : > { %v2597_v58 = vmax.f32 %v2525_v54, 0.0 }
 0x4e6   : > { %v2631_v59 = vpack.c.bf16 %v2599_v56, %v2598_v55 }
 0x4e7   : > { %v2630_v60 = vpack.c.bf16 %v2597_v58, %v2596_v57 }
 0x4e9   : > { %4569 = vmatprep.mubr.bf16.mxu1 %v2630_v60 }
 0x4ea   : > { %4570 = vmatmul.mubr.bf16.gmra.mrb[184].mxu1 %v2631_v59 }
 0x545   : > { %v4511_v61 = vpop.f32.mrb[192].mxu0 }
 0x546   : > { %v2739_v63 = vpop.f32.mrb[193].mxu0  ;;  %v2748_v25 = vadd.f32 %v4511_v61, %v5389_v62 }
 0x547   : > { %v4512_v0 = vpop.f32.mrb[194].mxu0  ;;  %v2740_v3 = vadd.f32 %v5389_v62, %v2739_v63 }
 0x548   : > { %v2751_v1 = vadd.f32 %v4512_v0, %v5389_v62  ;;  %v2742_v2 = vpop.f32.mrb[195].mxu0 }
 0x549   : > { %v2743_v4 = vadd.f32 %v5389_v62, %v2742_v2 }
 0x54a   : > { %v3688_v5 = vpack.c.bf16 %v2751_v1, %v2748_v25 }
 0x54b   : > { %v3683_v6 = vpack.c.bf16 %v2743_v4, %v2740_v3 }
 0x54c   : > { %3840 = vst [vmem:[%s5397_s28 + $0x8] sm:$0xff] %v3688_v5  }
 0x54d   : > { %3684 = vst [vmem:[%s5397_s28] sm:$0xff] %v3683_v6   ;;  %v4515_v7 = vpop.f32.mrb[128].mxu1 }
 0x54e   : > { %v2755_v8 = vpop.f32.mrb[129].mxu1  ;;  %v2764_v10 = vadd.f32 %v4515_v7, %v5389_v62 }
 0x54f   : > { %v4516_v9 = vpop.f32.mrb[130].mxu1  ;;  %v2756_v13 = vadd.f32 %v5389_v62, %v2755_v8 }
 0x550   : > { %v2767_v11 = vadd.f32 %v4516_v9, %v5389_v62  ;;  %v2758_v12 = vpop.f32.mrb[131].mxu1 }
 0x551   : > { %v2759_v14 = vadd.f32 %v5389_v62, %v2758_v12 }
 0x552   : > { %v3698_v15 = vpack.c.bf16 %v2767_v11, %v2764_v10 }
 0x553   : > { %v3693_v16 = vpack.c.bf16 %v2759_v14, %v2756_v13 }
 0x554   : > { %3842 = vst [vmem:[%s5397_s28 + $0x18] sm:$0xff] %v3698_v15  }
 0x555   : > { %3841 = vst [vmem:[%s5397_s28 + $0x10] sm:$0xff] %v3693_v16   ;;  %v4519_v17 = vpop.f32.mrb[132].mxu1 }
 0x556   : > { %v2771_v18 = vpop.f32.mrb[133].mxu1  ;;  %v2780_v20 = vadd.f32 %v4519_v17, %v5389_v62 }
 0x557   : > { %v4520_v19 = vpop.f32.mrb[134].mxu1  ;;  %v2772_v23 = vadd.f32 %v5389_v62, %v2771_v18 }
 0x558   : > { %v2783_v21 = vadd.f32 %v4520_v19, %v5389_v62  ;;  %v2774_v22 = vpop.f32.mrb[135].mxu1 }
 0x559   : > { %v2775_v24 = vadd.f32 %v5389_v62, %v2774_v22 }
 0x55a   : > { %v3708_v26 = vpack.c.bf16 %v2783_v21, %v2780_v20 }
 0x55b   : > { %v3703_v27 = vpack.c.bf16 %v2775_v24, %v2772_v23 }
 0x55c   : > { %3844 = vst [vmem:[%s5397_s28 + $0x28] sm:$0xff] %v3708_v26  }
 0x55d   : > { %3843 = vst [vmem:[%s5397_s28 + $0x20] sm:$0xff] %v3703_v27   ;;  %v4523_v28 = vpop.f32.mrb[136].mxu1 }
 0x55e   : > { %v2787_v29 = vpop.f32.mrb[137].mxu1  ;;  %v2796_v30 = vadd.f32 %v4523_v28, %v5389_v62 }
 0x55f   : > { %v4524_v47 = vpop.f32.mrb[138].mxu1  ;;  %v2788_v33 = vadd.f32 %v5389_v62, %v2787_v29 }
 0x560   : > { %v2799_v31 = vadd.f32 %v4524_v47, %v5389_v62  ;;  %v2790_v32 = vpop.f32.mrb[139].mxu1 }
 0x561   : > { %v2791_v34 = vadd.f32 %v5389_v62, %v2790_v32 }
 0x562   : > { %v3718_v35 = vpack.c.bf16 %v2799_v31, %v2796_v30 }
 0x563   : > { %v3713_v36 = vpack.c.bf16 %v2791_v34, %v2788_v33 }
 0x564   : > { %3846 = vst [vmem:[%s5397_s28 + $0x38] sm:$0xff] %v3718_v35  }
 0x565   : > { %3845 = vst [vmem:[%s5397_s28 + $0x30] sm:$0xff] %v3713_v36   ;;  %v4527_v37 = vpop.f32.mrb[140].mxu1 }
 0x566   : > { %v2803_v38 = vpop.f32.mrb[141].mxu1  ;;  %v2812_v40 = vadd.f32 %v4527_v37, %v5389_v62 }
 0x567   : > { %v4528_v39 = vpop.f32.mrb[142].mxu1  ;;  %v2804_v43 = vadd.f32 %v5389_v62, %v2803_v38 }
 0x568   : > { %v2815_v41 = vadd.f32 %v4528_v39, %v5389_v62  ;;  %v2806_v42 = vpop.f32.mrb[143].mxu1 }
 0x569   : > { %v2807_v45 = vadd.f32 %v5389_v62, %v2806_v42 }
 0x56a   : > { %v3728_v46 = vpack.c.bf16 %v2815_v41, %v2812_v40 }
 0x56b   : > { %v3723_v44 = vpack.c.bf16 %v2807_v45, %v2804_v43 }
 0x56c   : > { %3848 = vst [vmem:[%s5397_s28 + $0x48] sm:$0xff] %v3728_v46  }
 0x56d   : > { %3847 = vst [vmem:[%s5397_s28 + $0x40] sm:$0xff] %v3723_v44   ;;  %v4531_v48 = vpop.f32.mrb[144].mxu1 }
 0x56e   : > { %v2819_v49 = vpop.f32.mrb[145].mxu1  ;;  %v2828_v51 = vadd.f32 %v4531_v48, %v5389_v62 }
 0x56f   : > { %v4532_v50 = vpop.f32.mrb[146].mxu1  ;;  %v2820_v54 = vadd.f32 %v5389_v62, %v2819_v49 }
 0x570   : > { %v2831_v52 = vadd.f32 %v4532_v50, %v5389_v62  ;;  %v2822_v53 = vpop.f32.mrb[147].mxu1 }
 0x571   : > { %v2823_v55 = vadd.f32 %v5389_v62, %v2822_v53 }
 0x572   : > { %v3738_v56 = vpack.c.bf16 %v2831_v52, %v2828_v51 }
 0x573   : > { %v3733_v57 = vpack.c.bf16 %v2823_v55, %v2820_v54 }
 0x574   : > { %3850 = vst [vmem:[%s5397_s28 + $0x58] sm:$0xff] %v3738_v56  }
 0x575   : > { %3849 = vst [vmem:[%s5397_s28 + $0x50] sm:$0xff] %v3733_v57   ;;  %v4535_v58 = vpop.f32.mrb[148].mxu1 }
 0x576   : > { %v2835_v59 = vpop.f32.mrb[149].mxu1  ;;  %v2844_v61 = vadd.f32 %v4535_v58, %v5389_v62 }
 0x577   : > { %v4536_v60 = vpop.f32.mrb[150].mxu1  ;;  %v2836_v25 = vadd.f32 %v5389_v62, %v2835_v59 }
 0x578   : > { %v2847_v63 = vadd.f32 %v4536_v60, %v5389_v62  ;;  %v2838_v0 = vpop.f32.mrb[151].mxu1 }
 0x579   : > { %v2839_v1 = vadd.f32 %v5389_v62, %v2838_v0 }
 0x57a   : > { %v3748_v2 = vpack.c.bf16 %v2847_v63, %v2844_v61 }
 0x57b   : > { %v3743_v3 = vpack.c.bf16 %v2839_v1, %v2836_v25 }
 0x57c   : > { %3852 = vst [vmem:[%s5397_s28 + $0x68] sm:$0xff] %v3748_v2  }
 0x57d   : > { %3851 = vst [vmem:[%s5397_s28 + $0x60] sm:$0xff] %v3743_v3   ;;  %v4539_v4 = vpop.f32.mrb[152].mxu1 }
 0x57e   : > { %v2851_v5 = vpop.f32.mrb[153].mxu1  ;;  %v2860_v7 = vadd.f32 %v4539_v4, %v5389_v62 }
 0x57f   : > { %v4540_v6 = vpop.f32.mrb[154].mxu1  ;;  %v2852_v10 = vadd.f32 %v5389_v62, %v2851_v5 }
 0x580   : > { %v2863_v8 = vadd.f32 %v4540_v6, %v5389_v62  ;;  %v2854_v9 = vpop.f32.mrb[155].mxu1 }
 0x581   : > { %v2855_v11 = vadd.f32 %v5389_v62, %v2854_v9 }
 0x582   : > { %v3758_v12 = vpack.c.bf16 %v2863_v8, %v2860_v7 }
 0x583   : > { %v3753_v13 = vpack.c.bf16 %v2855_v11, %v2852_v10 }
 0x584   : > { %3854 = vst [vmem:[%s5397_s28 + $0x78] sm:$0xff] %v3758_v12  }
 0x585   : > { %3853 = vst [vmem:[%s5397_s28 + $0x70] sm:$0xff] %v3753_v13   ;;  %v4543_v14 = vpop.f32.mrb[156].mxu1 }
 0x586   : > { %v2867_v15 = vpop.f32.mrb[157].mxu1  ;;  %v2876_v17 = vadd.f32 %v4543_v14, %v5389_v62 }
 0x587   : > { %v4544_v16 = vpop.f32.mrb[158].mxu1  ;;  %v2868_v20 = vadd.f32 %v5389_v62, %v2867_v15 }
 0x588   : > { %v2879_v18 = vadd.f32 %v4544_v16, %v5389_v62  ;;  %v2870_v19 = vpop.f32.mrb[159].mxu1 }
 0x589   : > { %v2871_v21 = vadd.f32 %v5389_v62, %v2870_v19 }
 0x58a   : > { %v3768_v22 = vpack.c.bf16 %v2879_v18, %v2876_v17 }
 0x58b   : > { %v3763_v23 = vpack.c.bf16 %v2871_v21, %v2868_v20 }
 0x58c   : > { %3856 = vst [vmem:[%s5397_s28 + $0x88] sm:$0xff] %v3768_v22  }
 0x58d   : > { %3855 = vst [vmem:[%s5397_s28 + $0x80] sm:$0xff] %v3763_v23   ;;  %v4547_v24 = vpop.f32.mrb[160].mxu1 }
 0x58e   : > { %v2883_v26 = vpop.f32.mrb[161].mxu1  ;;  %v2892_v28 = vadd.f32 %v4547_v24, %v5389_v62 }
 0x58f   : > { %v4548_v27 = vpop.f32.mrb[162].mxu1  ;;  %v2884_v30 = vadd.f32 %v5389_v62, %v2883_v26 }
 0x590   : > { %v2895_v29 = vadd.f32 %v4548_v27, %v5389_v62  ;;  %v2886_v47 = vpop.f32.mrb[163].mxu1 }
 0x591   : > { %v2887_v31 = vadd.f32 %v5389_v62, %v2886_v47 }
 0x592   : > { %v3778_v32 = vpack.c.bf16 %v2895_v29, %v2892_v28 }
 0x593   : > { %v3773_v33 = vpack.c.bf16 %v2887_v31, %v2884_v30 }
 0x594   : > { %3858 = vst [vmem:[%s5397_s28 + $0x98] sm:$0xff] %v3778_v32  }
 0x595   : > { %3857 = vst [vmem:[%s5397_s28 + $0x90] sm:$0xff] %v3773_v33   ;;  %v4551_v34 = vpop.f32.mrb[164].mxu1 }
 0x596   : > { %v2899_v35 = vpop.f32.mrb[165].mxu1  ;;  %v2908_v37 = vadd.f32 %v4551_v34, %v5389_v62 }
 0x597   : > { %v4552_v36 = vpop.f32.mrb[166].mxu1  ;;  %v2900_v40 = vadd.f32 %v5389_v62, %v2899_v35 }
 0x598   : > { %v2911_v38 = vadd.f32 %v4552_v36, %v5389_v62  ;;  %v2902_v39 = vpop.f32.mrb[167].mxu1 }
 0x599   : > { %v2903_v41 = vadd.f32 %v5389_v62, %v2902_v39 }
 0x59a   : > { %v3788_v42 = vpack.c.bf16 %v2911_v38, %v2908_v37 }
 0x59b   : > { %v3783_v43 = vpack.c.bf16 %v2903_v41, %v2900_v40 }
 0x59c   : > { %3860 = vst [vmem:[%s5397_s28 + $0xa8] sm:$0xff] %v3788_v42  }
 0x59d   : > { %3859 = vst [vmem:[%s5397_s28 + $0xa0] sm:$0xff] %v3783_v43   ;;  %v4555_v45 = vpop.f32.mrb[168].mxu1 }
 0x59e   : > { %v2915_v46 = vpop.f32.mrb[169].mxu1  ;;  %v2924_v48 = vadd.f32 %v4555_v45, %v5389_v62 }
 0x59f   : > { %v4556_v44 = vpop.f32.mrb[170].mxu1  ;;  %v2916_v51 = vadd.f32 %v5389_v62, %v2915_v46 }
 0x5a0   : > { %v2927_v49 = vadd.f32 %v4556_v44, %v5389_v62  ;;  %v2918_v50 = vpop.f32.mrb[171].mxu1 }
 0x5a1   : > { %v2919_v52 = vadd.f32 %v5389_v62, %v2918_v50 }
 0x5a2   : > { %v3798_v53 = vpack.c.bf16 %v2927_v49, %v2924_v48 }
 0x5a3   : > { %v3793_v54 = vpack.c.bf16 %v2919_v52, %v2916_v51 }
 0x5a4   : > { %3862 = vst [vmem:[%s5397_s28 + $0xb8] sm:$0xff] %v3798_v53  }
 0x5a5   : > { %3861 = vst [vmem:[%s5397_s28 + $0xb0] sm:$0xff] %v3793_v54   ;;  %v4559_v55 = vpop.f32.mrb[172].mxu1 }
 0x5a6   : > { %v2931_v56 = vpop.f32.mrb[173].mxu1  ;;  %v2940_v58 = vadd.f32 %v4559_v55, %v5389_v62 }
 0x5a7   : > { %v4560_v57 = vpop.f32.mrb[174].mxu1  ;;  %v2932_v61 = vadd.f32 %v5389_v62, %v2931_v56 }
 0x5a8   : > { %v2943_v59 = vadd.f32 %v4560_v57, %v5389_v62  ;;  %v2934_v60 = vpop.f32.mrb[175].mxu1 }
 0x5a9   : > { %v2935_v63 = vadd.f32 %v5389_v62, %v2934_v60 }
 0x5aa   : > { %v3808_v0 = vpack.c.bf16 %v2943_v59, %v2940_v58 }
 0x5ab   : > { %v3803_v25 = vpack.c.bf16 %v2935_v63, %v2932_v61 }
 0x5ac   : > { %3864 = vst [vmem:[%s5397_s28 + $0xc8] sm:$0xff] %v3808_v0  }
 0x5ad   : > { %3863 = vst [vmem:[%s5397_s28 + $0xc0] sm:$0xff] %v3803_v25   ;;  %v4563_v1 = vpop.f32.mrb[176].mxu1 }
 0x5ae   : > { %v2947_v2 = vpop.f32.mrb[177].mxu1  ;;  %v2956_v4 = vadd.f32 %v4563_v1, %v5389_v62 }
 0x5af   : > { %v4564_v3 = vpop.f32.mrb[178].mxu1  ;;  %v2948_v7 = vadd.f32 %v5389_v62, %v2947_v2 }
 0x5b0   : > { %v2959_v5 = vadd.f32 %v4564_v3, %v5389_v62  ;;  %v2950_v6 = vpop.f32.mrb[179].mxu1 }
 0x5b1   : > { %v2951_v8 = vadd.f32 %v5389_v62, %v2950_v6 }
 0x5b2   : > { %v3818_v9 = vpack.c.bf16 %v2959_v5, %v2956_v4 }
 0x5b3   : > { %v3813_v10 = vpack.c.bf16 %v2951_v8, %v2948_v7 }
 0x5b4   : > { %3866 = vst [vmem:[%s5397_s28 + $0xd8] sm:$0xff] %v3818_v9  }
 0x5b5   : > { %3865 = vst [vmem:[%s5397_s28 + $0xd0] sm:$0xff] %v3813_v10   ;;  %v4567_v11 = vpop.f32.mrb[180].mxu1 }
 0x5b6   : > { %v2963_v12 = vpop.f32.mrb[181].mxu1  ;;  %v2972_v14 = vadd.f32 %v4567_v11, %v5389_v62 }
 0x5b7   : > { %v4568_v13 = vpop.f32.mrb[182].mxu1  ;;  %v2964_v17 = vadd.f32 %v5389_v62, %v2963_v12 }
 0x5b8   : > { %v2975_v15 = vadd.f32 %v4568_v13, %v5389_v62  ;;  %v2966_v16 = vpop.f32.mrb[183].mxu1 }
 0x5b9   : > { %v2967_v18 = vadd.f32 %v5389_v62, %v2966_v16 }
 0x5ba   : > { %v3828_v19 = vpack.c.bf16 %v2975_v15, %v2972_v14 }
 0x5bb   : > { %v3823_v20 = vpack.c.bf16 %v2967_v18, %v2964_v17 }
 0x5bc   : > { %3868 = vst [vmem:[%s5397_s28 + $0xe8] sm:$0xff] %v3828_v19  }
 0x5bd   : > { %3867 = vst [vmem:[%s5397_s28 + $0xe0] sm:$0xff] %v3823_v20   ;;  %v4571_v21 = vpop.f32.mrb[184].mxu1 }
 0x5be   : > { %v2979_v22 = vpop.f32.mrb[185].mxu1  ;;  %v2988_v24 = vadd.f32 %v4571_v21, %v5389_v62 }
 0x5bf   : > { %v4572_v23 = vpop.f32.mrb[186].mxu1  ;;  %v2980_v28 = vadd.f32 %v5389_v62, %v2979_v22 }
 0x5c0   : > { %v2991_v26 = vadd.f32 %v4572_v23, %v5389_v62  ;;  %v2982_v27 = vpop.f32.mrb[187].mxu1 }
 0x5c1   : > { %v2983_v29 = vadd.f32 %v5389_v62, %v2982_v27 }
 0x5c2   : > { %v3838_v47 = vpack.c.bf16 %v2991_v26, %v2988_v24 }
 0x5c3   : > { %v3833_v30 = vpack.c.bf16 %v2983_v29, %v2980_v28 }
 0x5c4   : > { %3870 = vst [vmem:[%s5397_s28 + $0xf8] sm:$0xff] %v3838_v47  }
 0x5c5   : > { %3869 = vst [vmem:[%s5397_s28 + $0xf0] sm:$0xff] %v3833_v30  }
 0x5c6   : > { %4685 = shalt.err (!%p4682_p3)
}
 0x5c7   : > { %s4686_s12 = scalar_lea.hbm %s5494_s7, 4096  ;;  %s4690_s13 = scalar_lea.hbm %s5547_s4, 16384 }
 0x5c8   : > { %p4687_p4 = scmp.ne.s32.totalorder %s5494_s7, %s4686_s12  ;;  %p4691_p9 = scmp.lt.u32.totalorder %s5494_s7, %s5547_s4 }
 0x5c9   : > { %p4692_p10 = scmp.lt.u32.totalorder %s4690_s13, %s4686_s12  ;;  %p4694_p12 = scmp.lt.u32.totalorder %s4686_s12, %s5494_s7 }
 0x5ca   : > { %p4688_p7 = pnand %p4687_p4, %p4802_p5 }
 0x5cb   : > { %p4693_p11 = por %p4692_p10, %p4691_p9 }
 0x5cc   : > { %p4689_p8 = pneg %p4688_p7 }
 0x5cd   : > { %p4695_p13 = por %p4694_p12, %p4693_p11 }
 0x5cf   : > { %p4696_p0 = pnand %p4695_p13, %p4689_p8 }
 0x5d1   : > { %4699 = shalt.err (!%p4696_p0)
}
 0x5d2   : > { %s4737_s27 = smov 64   ;;  %s4738_s28 = smov 4  }
 0x5d3   : > { %4589 = dma.vmem_to_hbm [thread:$0]  (%p4802_p5), %s5496_s30, 4096, %s5494_s7, %s5502_s19, %s4737_s27, %s4737_s27, %s4738_s28  }
 0x5d4 PF: > { %p4595_p1 = scmp.ge.s32.totalorder %s4734_s18, 2  ;;  %s3343_s29 = sand.u32 1, %s4722_s15  }
 0x5d5   : > { %s3344_s5 = scalar_lea.sflag [#allocation3], %s3343_s29 }
 0x5d6   : > { %p4592_p2 = pnand %p4595_p1, %p4806_p6 }
 0x5d8   : > { %4717 = dma.done.wait (!%p4592_p2), %s3344_s5, 4096  }
 0x5d9   : > { %4719 = vsyncadd (!%p4592_p2), %s3344_s5, 4294963200  ;;  %p14_p3 = scmp.ge.s32.totalorder %s4789_s21, 6   ;;  %s5550_s15 = smov %s4726_s16 }
 0x5da   : > { %s5551_s16 = smov %s4730_s17  ;;  %s5552_s17 = smov %s4800_s24 }
 0x5db   : > { %s5553_s18 = smov %s4789_s21  ;;  %16 = sbr.rel (!%p14_p3) target bundleno = 3 (0x3), region = 80 }
 0x5e2   :  { %3349 = vsyncpa [#allocation3], 1 }
 0x5e3   :  { %3351 = vsyncpa [#allocation3 + $0x1], 1 }

</bundles_post_ra>
